<compile_context>
chip_gen: v6e
topology: v6e:2x2x1
jax: 0.10.0
libtpu: 0.0.40
codegen_flags: <defaults>
</compile_context>

<pallas_src>
import functools
import math

import jax
import jax.numpy as jnp
from jax.experimental import pallas as pl
from jax.experimental.pallas import tpu as pltpu

LEAKY_SLOPE = 0.2
BN_EPS = 0.8
BN_SCALE = 1.0 / math.sqrt(1.0 + BN_EPS)   # eval-mode BN with fresh running stats
VMEM_LIMIT = 64 * 1024 * 1024              # <= v7x physical VMEM, comfortable on v5e/v6e


def _cp(semantics):
    return pltpu.CompilerParams(dimension_semantics=semantics,
                                vmem_limit_bytes=VMEM_LIMIT)


def _tile(dim, target):
    """Whole dim when it is small, else an aligned target tile (grid uses cdiv)."""
    return dim if dim <= target else target


def _rep2(arr):
    """Whole 2-D array as a single block, replicated across a 1-D grid."""
    return pl.BlockSpec(arr.shape, lambda i: (0, 0))


# ----------------------------------------------------------------------------
# Kernel 1: tiled dense matmul (used for the hoisted GRU input projection)
# ----------------------------------------------------------------------------
def _linear_kernel(x_ref, w_ref, b_ref, o_ref):
    x = x_ref[...].astype(jnp.bfloat16)
    o_ref[...] = jnp.dot(x, w_ref[...], preferred_element_type=jnp.float32) + b_ref[...]


def linear(x, w_t, b, row_tile=512, col_tile=512):
    """y = x @ w_t + b.  w_t: bf16 [K, N] (pre-transposed), b: f32 [1, N]."""
    rows, k = x.shape
    n = w_t.shape[1]
    rt = _tile(rows, row_tile)
    ct = n if (n <= col_tile or n % 128 != 0) else col_tile   # 256-multiple when tiled
    return pl.pallas_call(
        _linear_kernel,
        out_shape=jax.ShapeDtypeStruct((rows, n), jnp.float32),
        grid=(pl.cdiv(rows, rt), pl.cdiv(n, ct)),
        in_specs=[
            pl.BlockSpec((rt, k), lambda i, j: (i, 0)),
            pl.BlockSpec((k, ct), lambda i, j: (0, j)),
            pl.BlockSpec((1, ct), lambda i, j: (0, j)),
        ],
        out_specs=pl.BlockSpec((rt, ct), lambda i, j: (i, j)),
        compiler_params=_cp(("parallel", "parallel")),
    )(x, w_t, b)


# ----------------------------------------------------------------------------
# Kernel 2: fused generator (Linear+BN+LeakyReLU x3, Linear+ReLU), row-tiled
# ----------------------------------------------------------------------------
def _generator_kernel(z_ref, w0_ref, b0_ref, w1_ref, b1_ref, w2_ref, b2_ref,
                      w3_ref, b3_ref, o_ref):
    def block(h, w_ref, b_ref):
        # Linear -> BatchNorm1d(eval, eps=0.8) -> LeakyReLU(0.2); f32 elementwise.
        y = (jnp.dot(h, w_ref[...], preferred_element_type=jnp.float32)
             + b_ref[...]) * BN_SCALE
        y = jnp.where(y >= 0.0, y, LEAKY_SLOPE * y)
        return y.astype(jnp.bfloat16)

    h = z_ref[...].astype(jnp.bfloat16)
    h = block(h, w0_ref, b0_ref)
    h = block(h, w1_ref, b1_ref)
    h = block(h, w2_ref, b2_ref)
    y = jnp.dot(h, w3_ref[...], preferred_element_type=jnp.float32) + b3_ref[...]
    o_ref[...] = jnp.maximum(y, 0.0)


def generator(z, p, out_dim, row_tile=512):
    rows, zdim = z.shape
    rt = _tile(rows, row_tile)
    return pl.pallas_call(
        _generator_kernel,
        out_shape=jax.ShapeDtypeStruct((rows, out_dim), jnp.float32),
        grid=(pl.cdiv(rows, rt),),
        in_specs=[pl.BlockSpec((rt, zdim), lambda i: (i, 0)),
                  _rep2(p["gen_w0_t"]), _rep2(p["gen_b0"]),
                  _rep2(p["gen_w1_t"]), _rep2(p["gen_b1"]),
                  _rep2(p["gen_w2_t"]), _rep2(p["gen_b2"]),
                  _rep2(p["gen_w3_t"]), _rep2(p["gen_b3"])],
        out_specs=pl.BlockSpec((rt, out_dim), lambda i: (i, 0)),
        compiler_params=_cp(("parallel",)),
    )(z, p["gen_w0_t"], p["gen_b0"], p["gen_w1_t"], p["gen_b1"],
      p["gen_w2_t"], p["gen_b2"], p["gen_w3_t"], p["gen_b3"])


# ----------------------------------------------------------------------------
# Kernel 3: GRU recurrence (input projection gi precomputed outside the loop)
# ----------------------------------------------------------------------------
def _gru_kernel(gi_ref, whh_ref, bhh_ref, h_ref):
    t = pl.program_id(0)

    @pl.when(t == 0)
    def _():
        h_ref[...] = jnp.zeros_like(h_ref)

    h = h_ref[...]                         # [B, H] f32, resident across time steps
    hid = h.shape[-1]
    gi = gi_ref[0]                         # [B, 3H] f32, precomputed x @ Wih + bih
    gh = jnp.dot(h.astype(jnp.bfloat16), whh_ref[...],
                 preferred_element_type=jnp.float32) + bhh_ref[...]
    r = jax.nn.sigmoid(gi[:, :hid] + gh[:, :hid])
    z = jax.nn.sigmoid(gi[:, hid:2 * hid] + gh[:, hid:2 * hid])
    n = jnp.tanh(gi[:, 2 * hid:] + r * gh[:, 2 * hid:])
    h_ref[...] = (1.0 - z) * n + z * h


def gru_last_hidden(gi_tbh, whh_t, bhh, hid):
    T, B, G = gi_tbh.shape
    return pl.pallas_call(
        _gru_kernel,
        out_shape=jax.ShapeDtypeStruct((B, hid), jnp.float32),
        grid=(T,),
        in_specs=[
            pl.BlockSpec((1, B, G), lambda t: (t, 0, 0)),
            pl.BlockSpec((hid, G), lambda t: (0, 0)),
            pl.BlockSpec((1, G), lambda t: (0, 0)),
        ],
        out_specs=pl.BlockSpec((B, hid), lambda t: (0, 0)),
        compiler_params=_cp(("arbitrary",)),
    )(gi_tbh, whh_t, bhh)


# ----------------------------------------------------------------------------
# Kernel 4: fused v_proj + q_proj + attention logits + softmax + pooling
# ----------------------------------------------------------------------------
def _attention_kernel(v_ref, q_ref, wv_ref, bv_ref, wq_ref, bq_ref,
                      wa_ref, ba_ref, o_ref):
    bb, C, F = v_ref.shape
    v = v_ref[...]                                              # [bb, C, F] f32

    # v_proj: relu(v @ Wv + bv) on the MXU (rows flattened to bb*C).
    v2 = v.reshape(bb * C, F).astype(jnp.bfloat16)
    vp = jnp.dot(v2, wv_ref[...], preferred_element_type=jnp.float32) + bv_ref[...]
    vp = jnp.maximum(vp, 0.0).reshape(bb, C, -1)                # [bb, C, H]

    # q_proj: relu(q @ Wq + bq).
    qp = jnp.dot(q_ref[...].astype(jnp.bfloat16), wq_ref[...],
                 preferred_element_type=jnp.float32) + bq_ref[...]
    qp = jnp.maximum(qp, 0.0)                                   # [bb, H]

    # Attention logits = Linear(H, 1)(vp * qp): contract H on the MXU.
    qw = (qp * wa_ref[...]).astype(jnp.bfloat16)                # [bb, H]
    logits = jnp.einsum("bch,bqh->bcq", vp.astype(jnp.bfloat16), qw[:, None, :],
                        preferred_element_type=jnp.float32)     # [bb, C, 1]
    logits = logits + ba_ref[0, 0]                              # SMEM scalar bias

    # Softmax over objects (torch dim 1); denominator reciprocal on the EUP.
    m = jnp.max(logits, axis=1, keepdims=True)
    e = jnp.exp(logits - m)
    att = e * pl.reciprocal(jnp.sum(e, axis=1, keepdims=True), approx=True)

    # Weighted pooling over objects: (att * v).sum(1) -> [bb, F].
    o_ref[...] = jnp.sum(att * v, axis=1)


def attention_pool(v_bcf, q_emb, p, batch_tile=8):
    B, C, F = v_bcf.shape
    H = q_emb.shape[1]
    bb = _tile(B, batch_tile)
    return pl.pallas_call(
        _attention_kernel,
        out_shape=jax.ShapeDtypeStruct((B, F), jnp.float32),
        grid=(pl.cdiv(B, bb),),
        in_specs=[
            pl.BlockSpec((bb, C, F), lambda i: (i, 0, 0)),
            pl.BlockSpec((bb, H), lambda i: (i, 0)),
            _rep2(p["att_vproj_w_t"]), _rep2(p["att_vproj_b"]),
            _rep2(p["att_qproj_w_t"]), _rep2(p["att_qproj_b"]),
            _rep2(p["att_lin_w"]),
            pl.BlockSpec(memory_space=pltpu.MemorySpace.SMEM),   # (1,1) scalar bias
        ],
        out_specs=pl.BlockSpec((bb, F), lambda i: (i, 0)),
        compiler_params=_cp(("parallel",)),
    )(v_bcf, q_emb, p["att_vproj_w_t"], p["att_vproj_b"],
      p["att_qproj_w_t"], p["att_qproj_b"], p["att_lin_w"], p["att_lin_b"])


# ----------------------------------------------------------------------------
# Kernel 5: fused q_net + v_net + joint repr + SimpleClassifier
# ----------------------------------------------------------------------------
def _tail_kernel(q_ref, ve_ref, wqn_ref, bqn_ref, wvn_ref, bvn_ref,
                 w1_ref, b1_ref, w2_ref, b2_ref, o_ref):
    q = q_ref[...].astype(jnp.bfloat16)
    ve = ve_ref[...].astype(jnp.bfloat16)
    q_repr = jnp.maximum(
        jnp.dot(q, wqn_ref[...], preferred_element_type=jnp.float32) + bqn_ref[...], 0.0)
    v_repr = jnp.maximum(
        jnp.dot(ve, wvn_ref[...], preferred_element_type=jnp.float32) + bvn_ref[...], 0.0)
    joint = (q_repr * v_repr).astype(jnp.bfloat16)
    h = jnp.maximum(
        jnp.dot(joint, w1_ref[...], preferred_element_type=jnp.float32) + b1_ref[...], 0.0)
    o_ref[...] = jnp.dot(h.astype(jnp.bfloat16), w2_ref[...],
                         preferred_element_type=jnp.float32) + b2_ref[...]


def tail_classifier(q_emb, v_emb, p, row_tile=256):
    B, H = q_emb.shape
    F = v_emb.shape[1]
    a_pad = p["cls_w2_t"].shape[1]          # lane-dense (multiple of 128)
    rb = _tile(B, row_tile)
    return pl.pallas_call(
        _tail_kernel,
        out_shape=jax.ShapeDtypeStruct((B, a_pad), jnp.float32),
        grid=(pl.cdiv(B, rb),),
        in_specs=[
            pl.BlockSpec((rb, H), lambda i: (i, 0)),
            pl.BlockSpec((rb, F), lambda i: (i, 0)),
            _rep2(p["qnet_w_t"]), _rep2(p["qnet_b"]),
            _rep2(p["vnet_w_t"]), _rep2(p["vnet_b"]),
            _rep2(p["cls_w1_t"]), _rep2(p["cls_b1"]),
            _rep2(p["cls_w2_t"]), _rep2(p["cls_b2"]),
        ],
        out_specs=pl.BlockSpec((rb, a_pad), lambda i: (i, 0)),
        compiler_params=_cp(("parallel",)),
    )(q_emb, v_emb, p["qnet_w_t"], p["qnet_b"], p["vnet_w_t"], p["vnet_b"],
      p["cls_w1_t"], p["cls_b1"], p["cls_w2_t"], p["cls_b2"])


# ----------------------------------------------------------------------------
# Parameter initialization (deterministic, kaiming-normal style; weights bf16)
# ----------------------------------------------------------------------------
def _kaiming_bf16(key, in_dim, out_dim):
    # PyTorch Linear weight is [out, in]; we store the transpose [in, out] in bf16.
    w = jax.random.normal(key, (in_dim, out_dim), jnp.float32) * math.sqrt(2.0 / in_dim)
    return w.astype(jnp.bfloat16)


def init_params(key, ntoken, emb_dim, num_hid, v_dim, num_ans):
    ks = iter(jax.random.split(key, 32))
    H = num_hid
    p = {}
    # WordEmbedding (ntoken + 1 rows, padding row zeroed)
    emb = jax.random.normal(next(ks), (ntoken + 1, emb_dim), jnp.float32) * 0.1
    p["emb"] = emb.at[ntoken].set(0.0)
    # GRU(emb_dim -> H); weights pre-transposed [in, 3H]
    k = 1.0 / math.sqrt(H)
    p["gru_wih_t"] = jax.random.uniform(
        next(ks), (emb_dim, 3 * H), jnp.float32, -k, k).astype(jnp.bfloat16)
    p["gru_whh_t"] = jax.random.uniform(
        next(ks), (H, 3 * H), jnp.float32, -k, k).astype(jnp.bfloat16)
    p["gru_bih"] = jax.random.uniform(next(ks), (1, 3 * H), jnp.float32, -k, k)
    p["gru_bhh"] = jax.random.uniform(next(ks), (1, 3 * H), jnp.float32, -k, k)
    # generator: H//8 -> H//4 -> H//2 -> H -> 2H
    dims = [H // 8, H // 4, H // 2, H, 2 * H]
    for i in range(4):
        p[f"gen_w{i}_t"] = _kaiming_bf16(next(ks), dims[i], dims[i + 1])
        p[f"gen_b{i}"] = jnp.zeros((1, dims[i + 1]), jnp.float32)
    # NewAttention
    p["att_vproj_w_t"] = _kaiming_bf16(next(ks), v_dim, H)
    p["att_vproj_b"] = jnp.zeros((1, H), jnp.float32)
    p["att_qproj_w_t"] = _kaiming_bf16(next(ks), H, H)
    p["att_qproj_b"] = jnp.zeros((1, H), jnp.float32)
    p["att_lin_w"] = jax.random.normal(next(ks), (1, H), jnp.float32) * math.sqrt(2.0 / H)
    p["att_lin_b"] = jnp.zeros((1, 1), jnp.float32)
    # q_net / v_net
    p["qnet_w_t"] = _kaiming_bf16(next(ks), H, H)
    p["qnet_b"] = jnp.zeros((1, H), jnp.float32)
    p["vnet_w_t"] = _kaiming_bf16(next(ks), v_dim, H)
    p["vnet_b"] = jnp.zeros((1, H), jnp.float32)
    # classifier: H -> 2H -> num_ans, output padded to a multiple of 128 lanes
    a_pad = ((num_ans + 127) // 128) * 128
    p["cls_w1_t"] = _kaiming_bf16(next(ks), H, 2 * H)
    p["cls_b1"] = jnp.zeros((1, 2 * H), jnp.float32)
    w2 = jax.random.normal(next(ks), (2 * H, num_ans), jnp.float32) * math.sqrt(1.0 / H)
    p["cls_w2_t"] = jnp.pad(w2, ((0, 0), (0, a_pad - num_ans))).astype(jnp.bfloat16)
    p["cls_b2"] = jnp.zeros((1, a_pad), jnp.float32)
    return p


# ----------------------------------------------------------------------------
# IOG forward
# ----------------------------------------------------------------------------
def iog_forward(params, v, q_tokens, noise_key, *, num_hid, num_ans, gen=True):
    B, C, F = v.shape
    H = num_hid
    T = q_tokens.shape[1]

    # w_emb = self.w_emb(q): embedding gather produced directly in [T, B, E]
    # layout (only the tiny int32 token matrix is transposed, never f32 data).
    x_tbe = jnp.take(params["emb"], q_tokens.T, axis=0)                  # [T, B, 300]
    E = x_tbe.shape[-1]

    # q_emb: GRU final hidden state. The input projection gi is hoisted out of
    # the sequential loop and done as one tiled MXU matmul; only the aligned
    # h @ Whh recurrence stays inside the sequential kernel.
    gi = linear(x_tbe.reshape(T * B, E), params["gru_wih_t"], params["gru_bih"])
    q_emb = gru_last_hidden(gi.reshape(T, B, 3 * H), params["gru_whh_t"],
                            params["gru_bhh"], H)                        # [B, H]

    if gen:
        # TODO(synk): original code hardcodes 128 noise dims (assumes num_hid=1024).
        noise_dim = params["gen_w0_t"].shape[0]
        v_z = jax.random.normal(noise_key, (B * C, noise_dim), jnp.float32)
        v = generator(v_z, params, 2 * H).reshape(B, C, F)               # F == 2*num_hid

    # NewAttention + softmax over objects + weighted pooling, fused.
    v_emb = attention_pool(v, q_emb, params)                             # [B, F]

    # q_net / v_net / joint repr / classifier, fused; un-pad the answer dim.
    logits = tail_classifier(q_emb, v_emb, params)                       # [B, A_pad]
    return logits[:, :num_ans]


# ----------------------------------------------------------------------------
if __name__ == "__main__":
    B, C = 2, 8            # batch, number of visual objects
    NUM_HID = 32
    V_DIM = 2 * NUM_HID    # generate() outputs num_hid*2 features -> v_dim
    T = 8                  # question length
    EMB_DIM = 300
    NTOKEN = 50
    NUM_ANS = 16

    root = jax.random.PRNGKey(0)
    k_params, k_q, k_v, k_noise = jax.random.split(root, 4)

    params = init_params(k_params, NTOKEN, EMB_DIM, NUM_HID, V_DIM, NUM_ANS)
    q_tokens = jax.random.randint(k_q, (B, T), 0, NTOKEN, dtype=jnp.int32)
    v = jax.random.normal(k_v, (B, C, V_DIM), jnp.float32)

    fwd = jax.jit(functools.partial(iog_forward, num_hid=NUM_HID,
                                    num_ans=NUM_ANS, gen=True))
    logits = jax.block_until_ready(fwd(params, v, q_tokens, k_noise))
    assert logits.shape == (B, NUM_ANS), logits.shape
    assert bool(jnp.all(jnp.isfinite(logits)))
    print("KERNEL_OK")
</pallas_src>

<mosaic_0001>
module attributes {stable_mosaic.version = 11 : i64} {
  func.func @_gru_kernel(%arg0: i32, %arg1: memref<1x2x96xf32, #tpu.memory_space<vmem>>, %arg2: memref<32x96xbf16, #tpu.memory_space<vmem>>, %arg3: memref<1x96xf32, #tpu.memory_space<vmem>>, %arg4: memref<2x32xf32, #tpu.memory_space<vmem>>) attributes {dimension_semantics = [#tpu.dimension_semantics<arbitrary>], iteration_bounds = array<i64: 8>, scalar_prefetch = 0 : i64, scratch_operands = 0 : i64, tpu.core_type = #tpu.core_type<tc>, window_params = [{transform_indices = @transform_0, window_bounds = array<i64: 1, 2, 96>}, {pipeline_mode = #tpu.pipeline_mode<synchronous>, transform_indices = @transform_1, window_bounds = array<i64: 32, 96>}, {pipeline_mode = #tpu.pipeline_mode<synchronous>, transform_indices = @transform_2, window_bounds = array<i64: 1, 96>}, {pipeline_mode = #tpu.pipeline_mode<synchronous>, transform_indices = @transform_3, window_bounds = array<i64: 2, 32>}]} {
    %c0_i32 = arith.constant 0 : i32
    %0 = arith.cmpi eq, %arg0, %c0_i32 : i32
    %1 = arith.extui %0 : i1 to i32
    %c0_i32_0 = arith.constant 0 : i32
    %2 = arith.cmpi ne, %1, %c0_i32_0 : i32
    scf.if %2 {
      %cst_14 = arith.constant 0.000000e+00 : f32
      %39 = vector.broadcast %cst_14 : f32 to vector<2x32xf32>
      %c0_15 = arith.constant 0 : index
      %c0_16 = arith.constant 0 : index
      %40 = vector.load %arg4[%c0_15, %c0_16] : memref<2x32xf32, #tpu.memory_space<vmem>>, vector<2x32xf32>
      tpu.vector_store %arg4[%c0_15, %c0_16], %39 {strides = array<i32>} : memref<2x32xf32, #tpu.memory_space<vmem>>, vector<2x32xf32>,
    } else {
    }
    %c0 = arith.constant 0 : index
    %c0_1 = arith.constant 0 : index
    %3 = vector.load %arg4[%c0, %c0_1] : memref<2x32xf32, #tpu.memory_space<vmem>>, vector<2x32xf32>
    %c0_2 = arith.constant 0 : index
    %c0_3 = arith.constant 0 : index
    %c0_4 = arith.constant 0 : index
    %4 = vector.load %arg1[%c0_2, %c0_3, %c0_4] : memref<1x2x96xf32, #tpu.memory_space<vmem>>, vector<1x2x96xf32>
    %5 = vector.shape_cast %4 : vector<1x2x96xf32> to vector<2x96xf32>
    %6 = arith.truncf %3 : vector<2x32xf32> to vector<2x32xbf16>
    %c0_5 = arith.constant 0 : index
    %c0_6 = arith.constant 0 : index
    %7 = vector.load %arg2[%c0_5, %c0_6] : memref<32x96xbf16, #tpu.memory_space<vmem>>, vector<32x96xbf16>
    %cst = arith.constant dense<0.000000e+00> : vector<2x96xf32>
    %8 = tpu.matmul %6, %7, %cst {dimension_numbers = #tpu.dot_dimension_numbers<[1], [0], [0], [1], [0, 0, 1, 1], [], []>} : vector<2x32xbf16>, vector<32x96xbf16>, vector<2x96xf32> -> vector<2x96xf32>
    %c0_7 = arith.constant 0 : index
    %c0_8 = arith.constant 0 : index
    %9 = vector.load %arg3[%c0_7, %c0_8] : memref<1x96xf32, #tpu.memory_space<vmem>>, vector<1x96xf32>
    %10 = vector.broadcast %9 : vector<1x96xf32> to vector<2x96xf32>
    %11 = arith.addf %8, %10 : vector<2x96xf32>
    %12 = vector.extract_strided_slice %5 {offsets = [0, 0], sizes = [2, 32], strides = [1, 1]} : vector<2x96xf32> to vector<2x32xf32>
    %13 = vector.extract_strided_slice %11 {offsets = [0, 0], sizes = [2, 32], strides = [1, 1]} : vector<2x96xf32> to vector<2x32xf32>
    %14 = arith.addf %12, %13 : vector<2x32xf32>
    %15 = arith.negf %14 : vector<2x32xf32>
    %16 = math.exp %15 : vector<2x32xf32>
    %cst_9 = arith.constant 1.000000e+00 : f32
    %17 = vector.broadcast %cst_9 : f32 to vector<2x32xf32>
    %18 = arith.addf %17, %16 : vector<2x32xf32>
    %19 = arith.divf %17, %18 : vector<2x32xf32>
    %20 = vector.extract_strided_slice %5 {offsets = [0, 32], sizes = [2, 32], strides = [1, 1]} : vector<2x96xf32> to vector<2x32xf32>
    %21 = vector.extract_strided_slice %11 {offsets = [0, 32], sizes = [2, 32], strides = [1, 1]} : vector<2x96xf32> to vector<2x32xf32>
    %22 = arith.addf %20, %21 : vector<2x32xf32>
    %23 = arith.negf %22 : vector<2x32xf32>
    %24 = math.exp %23 : vector<2x32xf32>
    %cst_10 = arith.constant 1.000000e+00 : f32
    %25 = vector.broadcast %cst_10 : f32 to vector<2x32xf32>
    %26 = arith.addf %25, %24 : vector<2x32xf32>
    %27 = arith.divf %25, %26 : vector<2x32xf32>
    %28 = vector.extract_strided_slice %5 {offsets = [0, 64], sizes = [2, 32], strides = [1, 1]} : vector<2x96xf32> to vector<2x32xf32>
    %29 = vector.extract_strided_slice %11 {offsets = [0, 64], sizes = [2, 32], strides = [1, 1]} : vector<2x96xf32> to vector<2x32xf32>
    %30 = arith.mulf %19, %29 : vector<2x32xf32>
    %31 = arith.addf %28, %30 : vector<2x32xf32>
    %32 = math.tanh %31 : vector<2x32xf32>
    %cst_11 = arith.constant 1.000000e+00 : f32
    %33 = vector.broadcast %cst_11 : f32 to vector<2x32xf32>
    %34 = arith.subf %33, %27 : vector<2x32xf32>
    %35 = arith.mulf %34, %32 : vector<2x32xf32>
    %36 = arith.mulf %27, %3 : vector<2x32xf32>
    %37 = arith.addf %35, %36 : vector<2x32xf32>
    %c0_12 = arith.constant 0 : index
    %c0_13 = arith.constant 0 : index
    %38 = vector.load %arg4[%c0_12, %c0_13] : memref<2x32xf32, #tpu.memory_space<vmem>>, vector<2x32xf32>
    tpu.vector_store %arg4[%c0_12, %c0_13], %37 {strides = array<i32>} : memref<2x32xf32, #tpu.memory_space<vmem>>, vector<2x32xf32>,
    return
  }
  func.func @transform_0(%arg0: i32) -> (i32, i32, i32) {
    %c0_i32 = arith.constant 0 : i32
    %c0_i32_0 = arith.constant 0 : i32
    %c0_i32_1 = arith.constant 0 : i32
    return %arg0, %c0_i32, %c0_i32_0 : i32, i32, i32
  }
  func.func @transform_1(%arg0: i32) -> (i32, i32) {
    %c0_i32 = arith.constant 0 : i32
    %c0_i32_0 = arith.constant 0 : i32
    %c0_i32_1 = arith.constant 0 : i32
    return %c0_i32, %c0_i32_0 : i32, i32
  }
  func.func @transform_2(%arg0: i32) -> (i32, i32) {
    %c0_i32 = arith.constant 0 : i32
    %c0_i32_0 = arith.constant 0 : i32
    %c0_i32_1 = arith.constant 0 : i32
    return %c0_i32, %c0_i32_0 : i32, i32
  }
  func.func @transform_3(%arg0: i32) -> (i32, i32) {
    %c0_i32 = arith.constant 0 : i32
    %c0_i32_0 = arith.constant 0 : i32
    %c0_i32_1 = arith.constant 0 : i32
    return %c0_i32, %c0_i32_0 : i32, i32
  }
}

module attributes {stable_mosaic.version = 11 : i64} {
  func.func @_linear_kernel(%arg0: i32, %arg1: i32, %arg2: memref<16x300xf32, #tpu.memory_space<vmem>>, %arg3: memref<300x96xbf16, #tpu.memory_space<vmem>>, %arg4: memref<1x96xf32, #tpu.memory_space<vmem>>, %arg5: memref<16x96xf32, #tpu.memory_space<vmem>>) attributes {dimension_semantics = [#tpu.dimension_semantics<parallel>, #tpu.dimension_semantics<parallel>], iteration_bounds = array<i64: 1, 1>, scalar_prefetch = 0 : i64, scratch_operands = 0 : i64, tpu.core_type = #tpu.core_type<tc>, window_params = [{transform_indices = @transform_0, window_bounds = array<i64: 16, 300>}, {transform_indices = @transform_1, window_bounds = array<i64: 300, 96>}, {transform_indices = @transform_2, window_bounds = array<i64: 1, 96>}, {transform_indices = @transform_3, window_bounds = array<i64: 16, 96>}]} {
    %c0 = arith.constant 0 : index
    %c0_0 = arith.constant 0 : index
    %0 = vector.load %arg2[%c0, %c0_0] : memref<16x300xf32, #tpu.memory_space<vmem>>, vector<16x300xf32>
    %1 = arith.truncf %0 : vector<16x300xf32> to vector<16x300xbf16>
    %c0_1 = arith.constant 0 : index
    %c0_2 = arith.constant 0 : index
    %2 = vector.load %arg3[%c0_1, %c0_2] : memref<300x96xbf16, #tpu.memory_space<vmem>>, vector<300x96xbf16>
    %cst = arith.constant dense<0.000000e+00> : vector<16x96xf32>
    %3 = tpu.matmul %1, %2, %cst {dimension_numbers = #tpu.dot_dimension_numbers<[1], [0], [0], [1], [0, 0, 1, 1], [], []>} : vector<16x300xbf16>, vector<300x96xbf16>, vector<16x96xf32> -> vector<16x96xf32>
    %c0_3 = arith.constant 0 : index
    %c0_4 = arith.constant 0 : index
    %4 = vector.load %arg4[%c0_3, %c0_4] : memref<1x96xf32, #tpu.memory_space<vmem>>, vector<1x96xf32>
    %5 = vector.broadcast %4 : vector<1x96xf32> to vector<16x96xf32>
    %6 = arith.addf %3, %5 : vector<16x96xf32>
    %c0_5 = arith.constant 0 : index
    %c0_6 = arith.constant 0 : index
    %7 = vector.load %arg5[%c0_5, %c0_6] : memref<16x96xf32, #tpu.memory_space<vmem>>, vector<16x96xf32>
    tpu.vector_store %arg5[%c0_5, %c0_6], %6 {strides = array<i32>} : memref<16x96xf32, #tpu.memory_space<vmem>>, vector<16x96xf32>,
    return
  }
  func.func @transform_0(%arg0: i32, %arg1: i32) -> (i32, i32) {
    %c0_i32 = arith.constant 0 : i32
    %c0_i32_0 = arith.constant 0 : i32
    return %arg0, %c0_i32 : i32, i32
  }
  func.func @transform_1(%arg0: i32, %arg1: i32) -> (i32, i32) {
    %c0_i32 = arith.constant 0 : i32
    %c0_i32_0 = arith.constant 0 : i32
    return %c0_i32, %arg1 : i32, i32
  }
  func.func @transform_2(%arg0: i32, %arg1: i32) -> (i32, i32) {
    %c0_i32 = arith.constant 0 : i32
    %c0_i32_0 = arith.constant 0 : i32
    return %c0_i32, %arg1 : i32, i32
  }
  func.func @transform_3(%arg0: i32, %arg1: i32) -> (i32, i32) {
    %c0_i32 = arith.constant 0 : i32
    return %arg0, %arg1 : i32, i32
  }
}

module attributes {stable_mosaic.version = 11 : i64} {
  func.func @_generator_kernel(%arg0: i32, %arg1: memref<16x4xf32, #tpu.memory_space<vmem>>, %arg2: memref<4x8xbf16, #tpu.memory_space<vmem>>, %arg3: memref<1x8xf32, #tpu.memory_space<vmem>>, %arg4: memref<8x16xbf16, #tpu.memory_space<vmem>>, %arg5: memref<1x16xf32, #tpu.memory_space<vmem>>, %arg6: memref<16x32xbf16, #tpu.memory_space<vmem>>, %arg7: memref<1x32xf32, #tpu.memory_space<vmem>>, %arg8: memref<32x64xbf16, #tpu.memory_space<vmem>>, %arg9: memref<1x64xf32, #tpu.memory_space<vmem>>, %arg10: memref<16x64xf32, #tpu.memory_space<vmem>>) attributes {dimension_semantics = [#tpu.dimension_semantics<parallel>], iteration_bounds = array<i64: 1>, scalar_prefetch = 0 : i64, scratch_operands = 0 : i64, tpu.core_type = #tpu.core_type<tc>, window_params = [{transform_indices = @transform_0, window_bounds = array<i64: 16, 4>}, {pipeline_mode = #tpu.pipeline_mode<synchronous>, transform_indices = @transform_1, window_bounds = array<i64: 4, 8>}, {pipeline_mode = #tpu.pipeline_mode<synchronous>, transform_indices = @transform_2, window_bounds = array<i64: 1, 8>}, {pipeline_mode = #tpu.pipeline_mode<synchronous>, transform_indices = @transform_3, window_bounds = array<i64: 8, 16>}, {pipeline_mode = #tpu.pipeline_mode<synchronous>, transform_indices = @transform_4, window_bounds = array<i64: 1, 16>}, {pipeline_mode = #tpu.pipeline_mode<synchronous>, transform_indices = @transform_5, window_bounds = array<i64: 16, 32>}, {pipeline_mode = #tpu.pipeline_mode<synchronous>, transform_indices = @transform_6, window_bounds = array<i64: 1, 32>}, {pipeline_mode = #tpu.pipeline_mode<synchronous>, transform_indices = @transform_7, window_bounds = array<i64: 32, 64>}, {pipeline_mode = #tpu.pipeline_mode<synchronous>, transform_indices = @transform_8, window_bounds = array<i64: 1, 64>}, {transform_indices = @transform_9, window_bounds = array<i64: 16, 64>}]} {
    %c0 = arith.constant 0 : index
    %c0_0 = arith.constant 0 : index
    %0 = vector.load %arg1[%c0, %c0_0] : memref<16x4xf32, #tpu.memory_space<vmem>>, vector<16x4xf32>
    %1 = arith.truncf %0 : vector<16x4xf32> to vector<16x4xbf16>
    %c0_1 = arith.constant 0 : index
    %c0_2 = arith.constant 0 : index
    %2 = vector.load %arg2[%c0_1, %c0_2] : memref<4x8xbf16, #tpu.memory_space<vmem>>, vector<4x8xbf16>
    %cst = arith.constant dense<0.000000e+00> : vector<16x8xf32>
    %3 = tpu.matmul %1, %2, %cst {dimension_numbers = #tpu.dot_dimension_numbers<[1], [0], [0], [1], [0, 0, 1, 1], [], []>} : vector<16x4xbf16>, vector<4x8xbf16>, vector<16x8xf32> -> vector<16x8xf32>
    %c0_3 = arith.constant 0 : index
    %c0_4 = arith.constant 0 : index
    %4 = vector.load %arg3[%c0_3, %c0_4] : memref<1x8xf32, #tpu.memory_space<vmem>>, vector<1x8xf32>
    %5 = vector.broadcast %4 : vector<1x8xf32> to vector<16x8xf32>
    %6 = arith.addf %3, %5 : vector<16x8xf32>
    %cst_5 = arith.constant 0.745355964 : f32
    %7 = vector.broadcast %cst_5 : f32 to vector<16x8xf32>
    %8 = arith.mulf %6, %7 : vector<16x8xf32>
    %cst_6 = arith.constant 0.000000e+00 : f32
    %9 = vector.broadcast %cst_6 : f32 to vector<16x8xf32>
    %10 = arith.cmpf oge, %8, %9 : vector<16x8xf32>
    %cst_7 = arith.constant 2.000000e-01 : f32
    %11 = vector.broadcast %cst_7 : f32 to vector<16x8xf32>
    %12 = arith.mulf %11, %8 : vector<16x8xf32>
    %13 = arith.select %10, %8, %12 : vector<16x8xi1>, vector<16x8xf32>
    %14 = arith.truncf %13 : vector<16x8xf32> to vector<16x8xbf16>
    %c0_8 = arith.constant 0 : index
    %c0_9 = arith.constant 0 : index
    %15 = vector.load %arg4[%c0_8, %c0_9] : memref<8x16xbf16, #tpu.memory_space<vmem>>, vector<8x16xbf16>
    %cst_10 = arith.constant dense<0.000000e+00> : vector<16x16xf32>
    %16 = tpu.matmul %14, %15, %cst_10 {dimension_numbers = #tpu.dot_dimension_numbers<[1], [0], [0], [1], [0, 0, 1, 1], [], []>} : vector<16x8xbf16>, vector<8x16xbf16>, vector<16x16xf32> -> vector<16x16xf32>
    %c0_11 = arith.constant 0 : index
    %c0_12 = arith.constant 0 : index
    %17 = vector.load %arg5[%c0_11, %c0_12] : memref<1x16xf32, #tpu.memory_space<vmem>>, vector<1x16xf32>
    %18 = vector.broadcast %17 : vector<1x16xf32> to vector<16x16xf32>
    %19 = arith.addf %16, %18 : vector<16x16xf32>
    %cst_13 = arith.constant 0.745355964 : f32
    %20 = vector.broadcast %cst_13 : f32 to vector<16x16xf32>
    %21 = arith.mulf %19, %20 : vector<16x16xf32>
    %cst_14 = arith.constant 0.000000e+00 : f32
    %22 = vector.broadcast %cst_14 : f32 to vector<16x16xf32>
    %23 = arith.cmpf oge, %21, %22 : vector<16x16xf32>
    %cst_15 = arith.constant 2.000000e-01 : f32
    %24 = vector.broadcast %cst_15 : f32 to vector<16x16xf32>
    %25 = arith.mulf %24, %21 : vector<16x16xf32>
    %26 = arith.select %23, %21, %25 : vector<16x16xi1>, vector<16x16xf32>
    %27 = arith.truncf %26 : vector<16x16xf32> to vector<16x16xbf16>
    %c0_16 = arith.constant 0 : index
    %c0_17 = arith.constant 0 : index
    %28 = vector.load %arg6[%c0_16, %c0_17] : memref<16x32xbf16, #tpu.memory_space<vmem>>, vector<16x32xbf16>
    %cst_18 = arith.constant dense<0.000000e+00> : vector<16x32xf32>
    %29 = tpu.matmul %27, %28, %cst_18 {dimension_numbers = #tpu.dot_dimension_numbers<[1], [0], [0], [1], [0, 0, 1, 1], [], []>} : vector<16x16xbf16>, vector<16x32xbf16>, vector<16x32xf32> -> vector<16x32xf32>
    %c0_19 = arith.constant 0 : index
    %c0_20 = arith.constant 0 : index
    %30 = vector.load %arg7[%c0_19, %c0_20] : memref<1x32xf32, #tpu.memory_space<vmem>>, vector<1x32xf32>
    %31 = vector.broadcast %30 : vector<1x32xf32> to vector<16x32xf32>
    %32 = arith.addf %29, %31 : vector<16x32xf32>
    %cst_21 = arith.constant 0.745355964 : f32
    %33 = vector.broadcast %cst_21 : f32 to vector<16x32xf32>
    %34 = arith.mulf %32, %33 : vector<16x32xf32>
    %cst_22 = arith.constant 0.000000e+00 : f32
    %35 = vector.broadcast %cst_22 : f32 to vector<16x32xf32>
    %36 = arith.cmpf oge, %34, %35 : vector<16x32xf32>
    %cst_23 = arith.constant 2.000000e-01 : f32
    %37 = vector.broadcast %cst_23 : f32 to vector<16x32xf32>
    %38 = arith.mulf %37, %34 : vector<16x32xf32>
    %39 = arith.select %36, %34, %38 : vector<16x32xi1>, vector<16x32xf32>
    %40 = arith.truncf %39 : vector<16x32xf32> to vector<16x32xbf16>
    %c0_24 = arith.constant 0 : index
    %c0_25 = arith.constant 0 : index
    %41 = vector.load %arg8[%c0_24, %c0_25] : memref<32x64xbf16, #tpu.memory_space<vmem>>, vector<32x64xbf16>
    %cst_26 = arith.constant dense<0.000000e+00> : vector<16x64xf32>
    %42 = tpu.matmul %40, %41, %cst_26 {dimension_numbers = #tpu.dot_dimension_numbers<[1], [0], [0], [1], [0, 0, 1, 1], [], []>} : vector<16x32xbf16>, vector<32x64xbf16>, vector<16x64xf32> -> vector<16x64xf32>
    %c0_27 = arith.constant 0 : index
    %c0_28 = arith.constant 0 : index
    %43 = vector.load %arg9[%c0_27, %c0_28] : memref<1x64xf32, #tpu.memory_space<vmem>>, vector<1x64xf32>
    %44 = vector.broadcast %43 : vector<1x64xf32> to vector<16x64xf32>
    %45 = arith.addf %42, %44 : vector<16x64xf32>
    %cst_29 = arith.constant 0.000000e+00 : f32
    %46 = vector.broadcast %cst_29 : f32 to vector<16x64xf32>
    %47 = arith.maximumf %45, %46 : vector<16x64xf32>
    %c0_30 = arith.constant 0 : index
    %c0_31 = arith.constant 0 : index
    %48 = vector.load %arg10[%c0_30, %c0_31] : memref<16x64xf32, #tpu.memory_space<vmem>>, vector<16x64xf32>
    tpu.vector_store %arg10[%c0_30, %c0_31], %47 {strides = array<i32>} : memref<16x64xf32, #tpu.memory_space<vmem>>, vector<16x64xf32>,
    return
  }
  func.func @transform_0(%arg0: i32) -> (i32, i32) {
    %c0_i32 = arith.constant 0 : i32
    %c0_i32_0 = arith.constant 0 : i32
    return %arg0, %c0_i32 : i32, i32
  }
  func.func @transform_1(%arg0: i32) -> (i32, i32) {
    %c0_i32 = arith.constant 0 : i32
    %c0_i32_0 = arith.constant 0 : i32
    %c0_i32_1 = arith.constant 0 : i32
    return %c0_i32, %c0_i32_0 : i32, i32
  }
  func.func @transform_2(%arg0: i32) -> (i32, i32) {
    %c0_i32 = arith.constant 0 : i32
    %c0_i32_0 = arith.constant 0 : i32
    %c0_i32_1 = arith.constant 0 : i32
    return %c0_i32, %c0_i32_0 : i32, i32
  }
  func.func @transform_3(%arg0: i32) -> (i32, i32) {
    %c0_i32 = arith.constant 0 : i32
    %c0_i32_0 = arith.constant 0 : i32
    %c0_i32_1 = arith.constant 0 : i32
    return %c0_i32, %c0_i32_0 : i32, i32
  }
  func.func @transform_4(%arg0: i32) -> (i32, i32) {
    %c0_i32 = arith.constant 0 : i32
    %c0_i32_0 = arith.constant 0 : i32
    %c0_i32_1 = arith.constant 0 : i32
    return %c0_i32, %c0_i32_0 : i32, i32
  }
  func.func @transform_5(%arg0: i32) -> (i32, i32) {
    %c0_i32 = arith.constant 0 : i32
    %c0_i32_0 = arith.constant 0 : i32
    %c0_i32_1 = arith.constant 0 : i32
    return %c0_i32, %c0_i32_0 : i32, i32
  }
  func.func @transform_6(%arg0: i32) -> (i32, i32) {
    %c0_i32 = arith.constant 0 : i32
    %c0_i32_0 = arith.constant 0 : i32
    %c0_i32_1 = arith.constant 0 : i32
    return %c0_i32, %c0_i32_0 : i32, i32
  }
  func.func @transform_7(%arg0: i32) -> (i32, i32) {
    %c0_i32 = arith.constant 0 : i32
    %c0_i32_0 = arith.constant 0 : i32
    %c0_i32_1 = arith.constant 0 : i32
    return %c0_i32, %c0_i32_0 : i32, i32
  }
  func.func @transform_8(%arg0: i32) -> (i32, i32) {
    %c0_i32 = arith.constant 0 : i32
    %c0_i32_0 = arith.constant 0 : i32
    %c0_i32_1 = arith.constant 0 : i32
    return %c0_i32, %c0_i32_0 : i32, i32
  }
  func.func @transform_9(%arg0: i32) -> (i32, i32) {
    %c0_i32 = arith.constant 0 : i32
    %c0_i32_0 = arith.constant 0 : i32
    return %arg0, %c0_i32 : i32, i32
  }
}

module attributes {stable_mosaic.version = 11 : i64} {
  func.func @_attention_kernel(%arg0: i32, %arg1: memref<2x8x64xf32, #tpu.memory_space<vmem>>, %arg2: memref<2x32xf32, #tpu.memory_space<vmem>>, %arg3: memref<64x32xbf16, #tpu.memory_space<vmem>>, %arg4: memref<1x32xf32, #tpu.memory_space<vmem>>, %arg5: memref<32x32xbf16, #tpu.memory_space<vmem>>, %arg6: memref<1x32xf32, #tpu.memory_space<vmem>>, %arg7: memref<1x32xf32, #tpu.memory_space<vmem>>, %arg8: memref<1x1xf32, #tpu.memory_space<smem>>, %arg9: memref<2x64xf32, #tpu.memory_space<vmem>>) attributes {dimension_semantics = [#tpu.dimension_semantics<parallel>], iteration_bounds = array<i64: 1>, scalar_prefetch = 0 : i64, scratch_operands = 0 : i64, tpu.core_type = #tpu.core_type<tc>, window_params = [{transform_indices = @transform_0, window_bounds = array<i64: 2, 8, 64>}, {transform_indices = @transform_1, window_bounds = array<i64: 2, 32>}, {pipeline_mode = #tpu.pipeline_mode<synchronous>, transform_indices = @transform_2, window_bounds = array<i64: 64, 32>}, {pipeline_mode = #tpu.pipeline_mode<synchronous>, transform_indices = @transform_3, window_bounds = array<i64: 1, 32>}, {pipeline_mode = #tpu.pipeline_mode<synchronous>, transform_indices = @transform_4, window_bounds = array<i64: 32, 32>}, {pipeline_mode = #tpu.pipeline_mode<synchronous>, transform_indices = @transform_5, window_bounds = array<i64: 1, 32>}, {pipeline_mode = #tpu.pipeline_mode<synchronous>, transform_indices = @transform_6, window_bounds = array<i64: 1, 32>}, {transform_indices = @transform_7, window_bounds = array<i64: 1, 1>}, {transform_indices = @transform_8, window_bounds = array<i64: 2, 64>}]} {
    %c0 = arith.constant 0 : index
    %c0_0 = arith.constant 0 : index
    %c0_1 = arith.constant 0 : index
    %0 = vector.load %arg1[%c0, %c0_0, %c0_1] : memref<2x8x64xf32, #tpu.memory_space<vmem>>, vector<2x8x64xf32>
    %1 = vector.shape_cast %0 : vector<2x8x64xf32> to vector<16x64xf32>
    %2 = arith.truncf %1 : vector<16x64xf32> to vector<16x64xbf16>
    %c0_2 = arith.constant 0 : index
    %c0_3 = arith.constant 0 : index
    %3 = vector.load %arg3[%c0_2, %c0_3] : memref<64x32xbf16, #tpu.memory_space<vmem>>, vector<64x32xbf16>
    %cst = arith.constant dense<0.000000e+00> : vector<16x32xf32>
    %4 = tpu.matmul %2, %3, %cst {dimension_numbers = #tpu.dot_dimension_numbers<[1], [0], [0], [1], [0, 0, 1, 1], [], []>} : vector<16x64xbf16>, vector<64x32xbf16>, vector<16x32xf32> -> vector<16x32xf32>
    %c0_4 = arith.constant 0 : index
    %c0_5 = arith.constant 0 : index
    %5 = vector.load %arg4[%c0_4, %c0_5] : memref<1x32xf32, #tpu.memory_space<vmem>>, vector<1x32xf32>
    %6 = vector.broadcast %5 : vector<1x32xf32> to vector<16x32xf32>
    %7 = arith.addf %4, %6 : vector<16x32xf32>
    %cst_6 = arith.constant 0.000000e+00 : f32
    %8 = vector.broadcast %cst_6 : f32 to vector<16x32xf32>
    %9 = arith.maximumf %7, %8 : vector<16x32xf32>
    %10 = vector.shape_cast %9 : vector<16x32xf32> to vector<2x8x32xf32>
    %c0_7 = arith.constant 0 : index
    %c0_8 = arith.constant 0 : index
    %11 = vector.load %arg2[%c0_7, %c0_8] : memref<2x32xf32, #tpu.memory_space<vmem>>, vector<2x32xf32>
    %12 = arith.truncf %11 : vector<2x32xf32> to vector<2x32xbf16>
    %c0_9 = arith.constant 0 : index
    %c0_10 = arith.constant 0 : index
    %13 = vector.load %arg5[%c0_9, %c0_10] : memref<32x32xbf16, #tpu.memory_space<vmem>>, vector<32x32xbf16>
    %cst_11 = arith.constant dense<0.000000e+00> : vector<2x32xf32>
    %14 = tpu.matmul %12, %13, %cst_11 {dimension_numbers = #tpu.dot_dimension_numbers<[1], [0], [0], [1], [0, 0, 1, 1], [], []>} : vector<2x32xbf16>, vector<32x32xbf16>, vector<2x32xf32> -> vector<2x32xf32>
    %c0_12 = arith.constant 0 : index
    %c0_13 = arith.constant 0 : index
    %15 = vector.load %arg6[%c0_12, %c0_13] : memref<1x32xf32, #tpu.memory_space<vmem>>, vector<1x32xf32>
    %16 = vector.broadcast %15 : vector<1x32xf32> to vector<2x32xf32>
    %17 = arith.addf %14, %16 : vector<2x32xf32>
    %cst_14 = arith.constant 0.000000e+00 : f32
    %18 = vector.broadcast %cst_14 : f32 to vector<2x32xf32>
    %19 = arith.maximumf %17, %18 : vector<2x32xf32>
    %c0_15 = arith.constant 0 : index
    %c0_16 = arith.constant 0 : index
    %20 = vector.load %arg7[%c0_15, %c0_16] : memref<1x32xf32, #tpu.memory_space<vmem>>, vector<1x32xf32>
    %21 = vector.broadcast %20 : vector<1x32xf32> to vector<2x32xf32>
    %22 = arith.mulf %19, %21 : vector<2x32xf32>
    %23 = arith.truncf %22 : vector<2x32xf32> to vector<2x32xbf16>
    %24 = arith.truncf %10 : vector<2x8x32xf32> to vector<2x8x32xbf16>
    %25 = vector.shape_cast %23 : vector<2x32xbf16> to vector<2x1x32xbf16>
    "tpu.trace_start"() <{level = 10 : i32, message = "bch,bqh->bcq"}> : () -> ()
    %cst_17 = arith.constant dense<0.000000e+00> : vector<2x8x1xf32>
    %26 = tpu.matmul %24, %25, %cst_17 {dimension_numbers = #tpu.dot_dimension_numbers<[2], [2], [1], [1], [0, 0, 0, 1, 1, 1], [0], [0]>} : vector<2x8x32xbf16>, vector<2x1x32xbf16>, vector<2x8x1xf32> -> vector<2x8x1xf32>
    "tpu.trace_stop"() : () -> ()
    %c0_18 = arith.constant 0 : index
    %c0_19 = arith.constant 0 : index
    %27 = memref.load %arg8[%c0_18, %c0_19] : memref<1x1xf32, #tpu.memory_space<smem>>
    %28 = vector.broadcast %27 : f32 to vector<2x8x1xf32>
    %29 = arith.addf %26, %28 : vector<2x8x1xf32>
    %cst_20 = arith.constant dense<0xFF800000> : vector<2x1xf32>
    %30 = vector.multi_reduction <maximumf>, %29, %cst_20 [1] : vector<2x8x1xf32> to vector<2x1xf32>
    %31 = vector.shape_cast %30 : vector<2x1xf32> to vector<2x1x1xf32>
    %32 = vector.broadcast %31 : vector<2x1x1xf32> to vector<2x8x1xf32>
    %33 = arith.subf %29, %32 : vector<2x8x1xf32>
    %34 = math.exp %33 : vector<2x8x1xf32>
    %cst_21 = arith.constant dense<0.000000e+00> : vector<2x1xf32>
    %35 = vector.multi_reduction <add>, %34, %cst_21 [1] : vector<2x8x1xf32> to vector<2x1xf32>
    %36 = vector.shape_cast %35 : vector<2x1xf32> to vector<2x1x1xf32>
    %37 = tpu.reciprocal %36 {approx = true} : vector<2x1x1xf32> -> vector<2x1x1xf32>
    %38 = vector.broadcast %37 : vector<2x1x1xf32> to vector<2x8x1xf32>
    %39 = arith.mulf %34, %38 : vector<2x8x1xf32>
    %40 = vector.broadcast %39 : vector<2x8x1xf32> to vector<2x8x64xf32>
    %41 = arith.mulf %40, %0 : vector<2x8x64xf32>
    %cst_22 = arith.constant dense<0.000000e+00> : vector<2x64xf32>
    %42 = vector.multi_reduction <add>, %41, %cst_22 [1] : vector<2x8x64xf32> to vector<2x64xf32>
    %c0_23 = arith.constant 0 : index
    %c0_24 = arith.constant 0 : index
    %43 = vector.load %arg9[%c0_23, %c0_24] : memref<2x64xf32, #tpu.memory_space<vmem>>, vector<2x64xf32>
    tpu.vector_store %arg9[%c0_23, %c0_24], %42 {strides = array<i32>} : memref<2x64xf32, #tpu.memory_space<vmem>>, vector<2x64xf32>,
    return
  }
  func.func @transform_0(%arg0: i32) -> (i32, i32, i32) {
    %c0_i32 = arith.constant 0 : i32
    %c0_i32_0 = arith.constant 0 : i32
    %c0_i32_1 = arith.constant 0 : i32
    return %arg0, %c0_i32, %c0_i32_0 : i32, i32, i32
  }
  func.func @transform_1(%arg0: i32) -> (i32, i32) {
    %c0_i32 = arith.constant 0 : i32
    %c0_i32_0 = arith.constant 0 : i32
    return %arg0, %c0_i32 : i32, i32
  }
  func.func @transform_2(%arg0: i32) -> (i32, i32) {
    %c0_i32 = arith.constant 0 : i32
    %c0_i32_0 = arith.constant 0 : i32
    %c0_i32_1 = arith.constant 0 : i32
    return %c0_i32, %c0_i32_0 : i32, i32
  }
  func.func @transform_3(%arg0: i32) -> (i32, i32) {
    %c0_i32 = arith.constant 0 : i32
    %c0_i32_0 = arith.constant 0 : i32
    %c0_i32_1 = arith.constant 0 : i32
    return %c0_i32, %c0_i32_0 : i32, i32
  }
  func.func @transform_4(%arg0: i32) -> (i32, i32) {
    %c0_i32 = arith.constant 0 : i32
    %c0_i32_0 = arith.constant 0 : i32
    %c0_i32_1 = arith.constant 0 : i32
    return %c0_i32, %c0_i32_0 : i32, i32
  }
  func.func @transform_5(%arg0: i32) -> (i32, i32) {
    %c0_i32 = arith.constant 0 : i32
    %c0_i32_0 = arith.constant 0 : i32
    %c0_i32_1 = arith.constant 0 : i32
    return %c0_i32, %c0_i32_0 : i32, i32
  }
  func.func @transform_6(%arg0: i32) -> (i32, i32) {
    %c0_i32 = arith.constant 0 : i32
    %c0_i32_0 = arith.constant 0 : i32
    %c0_i32_1 = arith.constant 0 : i32
    return %c0_i32, %c0_i32_0 : i32, i32
  }
  func.func @transform_7(%arg0: i32) -> (i32, i32) {
    %c0_i32 = arith.constant 0 : i32
    %c0_i32_0 = arith.constant 0 : i32
    %c0_i32_1 = arith.constant 0 : i32
    return %c0_i32, %c0_i32_0 : i32, i32
  }
  func.func @transform_8(%arg0: i32) -> (i32, i32) {
    %c0_i32 = arith.constant 0 : i32
    %c0_i32_0 = arith.constant 0 : i32
    return %arg0, %c0_i32 : i32, i32
  }
}

module attributes {stable_mosaic.version = 11 : i64} {
  func.func @_tail_kernel(%arg0: i32, %arg1: memref<2x32xf32, #tpu.memory_space<vmem>>, %arg2: memref<2x64xf32, #tpu.memory_space<vmem>>, %arg3: memref<32x32xbf16, #tpu.memory_space<vmem>>, %arg4: memref<1x32xf32, #tpu.memory_space<vmem>>, %arg5: memref<64x32xbf16, #tpu.memory_space<vmem>>, %arg6: memref<1x32xf32, #tpu.memory_space<vmem>>, %arg7: memref<32x64xbf16, #tpu.memory_space<vmem>>, %arg8: memref<1x64xf32, #tpu.memory_space<vmem>>, %arg9: memref<64x128xbf16, #tpu.memory_space<vmem>>, %arg10: memref<1x128xf32, #tpu.memory_space<vmem>>, %arg11: memref<2x128xf32, #tpu.memory_space<vmem>>) attributes {dimension_semantics = [#tpu.dimension_semantics<parallel>], iteration_bounds = array<i64: 1>, scalar_prefetch = 0 : i64, scratch_operands = 0 : i64, tpu.core_type = #tpu.core_type<tc>, window_params = [{transform_indices = @transform_0, window_bounds = array<i64: 2, 32>}, {transform_indices = @transform_1, window_bounds = array<i64: 2, 64>}, {pipeline_mode = #tpu.pipeline_mode<synchronous>, transform_indices = @transform_2, window_bounds = array<i64: 32, 32>}, {pipeline_mode = #tpu.pipeline_mode<synchronous>, transform_indices = @transform_3, window_bounds = array<i64: 1, 32>}, {pipeline_mode = #tpu.pipeline_mode<synchronous>, transform_indices = @transform_4, window_bounds = array<i64: 64, 32>}, {pipeline_mode = #tpu.pipeline_mode<synchronous>, transform_indices = @transform_5, window_bounds = array<i64: 1, 32>}, {pipeline_mode = #tpu.pipeline_mode<synchronous>, transform_indices = @transform_6, window_bounds = array<i64: 32, 64>}, {pipeline_mode = #tpu.pipeline_mode<synchronous>, transform_indices = @transform_7, window_bounds = array<i64: 1, 64>}, {pipeline_mode = #tpu.pipeline_mode<synchronous>, transform_indices = @transform_8, window_bounds = array<i64: 64, 128>}, {pipeline_mode = #tpu.pipeline_mode<synchronous>, transform_indices = @transform_9, window_bounds = array<i64: 1, 128>}, {transform_indices = @transform_10, window_bounds = array<i64: 2, 128>}]} {
    %c0 = arith.constant 0 : index
    %c0_0 = arith.constant 0 : index
    %0 = vector.load %arg1[%c0, %c0_0] : memref<2x32xf32, #tpu.memory_space<vmem>>, vector<2x32xf32>
    %1 = arith.truncf %0 : vector<2x32xf32> to vector<2x32xbf16>
    %c0_1 = arith.constant 0 : index
    %c0_2 = arith.constant 0 : index
    %2 = vector.load %arg2[%c0_1, %c0_2] : memref<2x64xf32, #tpu.memory_space<vmem>>, vector<2x64xf32>
    %3 = arith.truncf %2 : vector<2x64xf32> to vector<2x64xbf16>
    %c0_3 = arith.constant 0 : index
    %c0_4 = arith.constant 0 : index
    %4 = vector.load %arg3[%c0_3, %c0_4] : memref<32x32xbf16, #tpu.memory_space<vmem>>, vector<32x32xbf16>
    %cst = arith.constant dense<0.000000e+00> : vector<2x32xf32>
    %5 = tpu.matmul %1, %4, %cst {dimension_numbers = #tpu.dot_dimension_numbers<[1], [0], [0], [1], [0, 0, 1, 1], [], []>} : vector<2x32xbf16>, vector<32x32xbf16>, vector<2x32xf32> -> vector<2x32xf32>
    %c0_5 = arith.constant 0 : index
    %c0_6 = arith.constant 0 : index
    %6 = vector.load %arg4[%c0_5, %c0_6] : memref<1x32xf32, #tpu.memory_space<vmem>>, vector<1x32xf32>
    %7 = vector.broadcast %6 : vector<1x32xf32> to vector<2x32xf32>
    %8 = arith.addf %5, %7 : vector<2x32xf32>
    %cst_7 = arith.constant 0.000000e+00 : f32
    %9 = vector.broadcast %cst_7 : f32 to vector<2x32xf32>
    %10 = arith.maximumf %8, %9 : vector<2x32xf32>
    %c0_8 = arith.constant 0 : index
    %c0_9 = arith.constant 0 : index
    %11 = vector.load %arg5[%c0_8, %c0_9] : memref<64x32xbf16, #tpu.memory_space<vmem>>, vector<64x32xbf16>
    %cst_10 = arith.constant dense<0.000000e+00> : vector<2x32xf32>
    %12 = tpu.matmul %3, %11, %cst_10 {dimension_numbers = #tpu.dot_dimension_numbers<[1], [0], [0], [1], [0, 0, 1, 1], [], []>} : vector<2x64xbf16>, vector<64x32xbf16>, vector<2x32xf32> -> vector<2x32xf32>
    %c0_11 = arith.constant 0 : index
    %c0_12 = arith.constant 0 : index
    %13 = vector.load %arg6[%c0_11, %c0_12] : memref<1x32xf32, #tpu.memory_space<vmem>>, vector<1x32xf32>
    %14 = vector.broadcast %13 : vector<1x32xf32> to vector<2x32xf32>
    %15 = arith.addf %12, %14 : vector<2x32xf32>
    %cst_13 = arith.constant 0.000000e+00 : f32
    %16 = vector.broadcast %cst_13 : f32 to vector<2x32xf32>
    %17 = arith.maximumf %15, %16 : vector<2x32xf32>
    %18 = arith.mulf %10, %17 : vector<2x32xf32>
    %19 = arith.truncf %18 : vector<2x32xf32> to vector<2x32xbf16>
    %c0_14 = arith.constant 0 : index
    %c0_15 = arith.constant 0 : index
    %20 = vector.load %arg7[%c0_14, %c0_15] : memref<32x64xbf16, #tpu.memory_space<vmem>>, vector<32x64xbf16>
    %cst_16 = arith.constant dense<0.000000e+00> : vector<2x64xf32>
    %21 = tpu.matmul %19, %20, %cst_16 {dimension_numbers = #tpu.dot_dimension_numbers<[1], [0], [0], [1], [0, 0, 1, 1], [], []>} : vector<2x32xbf16>, vector<32x64xbf16>, vector<2x64xf32> -> vector<2x64xf32>
    %c0_17 = arith.constant 0 : index
    %c0_18 = arith.constant 0 : index
    %22 = vector.load %arg8[%c0_17, %c0_18] : memref<1x64xf32, #tpu.memory_space<vmem>>, vector<1x64xf32>
    %23 = vector.broadcast %22 : vector<1x64xf32> to vector<2x64xf32>
    %24 = arith.addf %21, %23 : vector<2x64xf32>
    %cst_19 = arith.constant 0.000000e+00 : f32
    %25 = vector.broadcast %cst_19 : f32 to vector<2x64xf32>
    %26 = arith.maximumf %24, %25 : vector<2x64xf32>
    %27 = arith.truncf %26 : vector<2x64xf32> to vector<2x64xbf16>
    %c0_20 = arith.constant 0 : index
    %c0_21 = arith.constant 0 : index
    %28 = vector.load %arg9[%c0_20, %c0_21] : memref<64x128xbf16, #tpu.memory_space<vmem>>, vector<64x128xbf16>
    %cst_22 = arith.constant dense<0.000000e+00> : vector<2x128xf32>
    %29 = tpu.matmul %27, %28, %cst_22 {dimension_numbers = #tpu.dot_dimension_numbers<[1], [0], [0], [1], [0, 0, 1, 1], [], []>} : vector<2x64xbf16>, vector<64x128xbf16>, vector<2x128xf32> -> vector<2x128xf32>
    %c0_23 = arith.constant 0 : index
    %c0_24 = arith.constant 0 : index
    %30 = vector.load %arg10[%c0_23, %c0_24] : memref<1x128xf32, #tpu.memory_space<vmem>>, vector<1x128xf32>
    %31 = vector.broadcast %30 : vector<1x128xf32> to vector<2x128xf32>
    %32 = arith.addf %29, %31 : vector<2x128xf32>
    %c0_25 = arith.constant 0 : index
    %c0_26 = arith.constant 0 : index
    %33 = vector.load %arg11[%c0_25, %c0_26] : memref<2x128xf32, #tpu.memory_space<vmem>>, vector<2x128xf32>
    tpu.vector_store %arg11[%c0_25, %c0_26], %32 {strides = array<i32>} : memref<2x128xf32, #tpu.memory_space<vmem>>, vector<2x128xf32>,
    return
  }
  func.func @transform_0(%arg0: i32) -> (i32, i32) {
    %c0_i32 = arith.constant 0 : i32
    %c0_i32_0 = arith.constant 0 : i32
    return %arg0, %c0_i32 : i32, i32
  }
  func.func @transform_1(%arg0: i32) -> (i32, i32) {
    %c0_i32 = arith.constant 0 : i32
    %c0_i32_0 = arith.constant 0 : i32
    return %arg0, %c0_i32 : i32, i32
  }
  func.func @transform_2(%arg0: i32) -> (i32, i32) {
    %c0_i32 = arith.constant 0 : i32
    %c0_i32_0 = arith.constant 0 : i32
    %c0_i32_1 = arith.constant 0 : i32
    return %c0_i32, %c0_i32_0 : i32, i32
  }
  func.func @transform_3(%arg0: i32) -> (i32, i32) {
    %c0_i32 = arith.constant 0 : i32
    %c0_i32_0 = arith.constant 0 : i32
    %c0_i32_1 = arith.constant 0 : i32
    return %c0_i32, %c0_i32_0 : i32, i32
  }
  func.func @transform_4(%arg0: i32) -> (i32, i32) {
    %c0_i32 = arith.constant 0 : i32
    %c0_i32_0 = arith.constant 0 : i32
    %c0_i32_1 = arith.constant 0 : i32
    return %c0_i32, %c0_i32_0 : i32, i32
  }
  func.func @transform_5(%arg0: i32) -> (i32, i32) {
    %c0_i32 = arith.constant 0 : i32
    %c0_i32_0 = arith.constant 0 : i32
    %c0_i32_1 = arith.constant 0 : i32
    return %c0_i32, %c0_i32_0 : i32, i32
  }
  func.func @transform_6(%arg0: i32) -> (i32, i32) {
    %c0_i32 = arith.constant 0 : i32
    %c0_i32_0 = arith.constant 0 : i32
    %c0_i32_1 = arith.constant 0 : i32
    return %c0_i32, %c0_i32_0 : i32, i32
  }
  func.func @transform_7(%arg0: i32) -> (i32, i32) {
    %c0_i32 = arith.constant 0 : i32
    %c0_i32_0 = arith.constant 0 : i32
    %c0_i32_1 = arith.constant 0 : i32
    return %c0_i32, %c0_i32_0 : i32, i32
  }
  func.func @transform_8(%arg0: i32) -> (i32, i32) {
    %c0_i32 = arith.constant 0 : i32
    %c0_i32_0 = arith.constant 0 : i32
    %c0_i32_1 = arith.constant 0 : i32
    return %c0_i32, %c0_i32_0 : i32, i32
  }
  func.func @transform_9(%arg0: i32) -> (i32, i32) {
    %c0_i32 = arith.constant 0 : i32
    %c0_i32_0 = arith.constant 0 : i32
    %c0_i32_1 = arith.constant 0 : i32
    return %c0_i32, %c0_i32_0 : i32, i32
  }
  func.func @transform_10(%arg0: i32) -> (i32, i32) {
    %c0_i32 = arith.constant 0 : i32
    %c0_i32_0 = arith.constant 0 : i32
    return %arg0, %c0_i32 : i32, i32
  }
}

</mosaic_0001>

<bundles_post_ra>
// kernel: iog_forward.6
= control target key start
LH: loop header
LB: loop body
LE: loop exit
PB: predicated region body
PF: predicated region fallthrough
CT: control target
= control target key end

     0   :  { %s374_s12 = smov 0   ;;  %s406_s0 = inlined_call_operand.vmem [shape: f32[8,2,96], index: 0, kind: input, shape index: {}]   ;;  %s407_s1 = inlined_call_operand.vmem [shape: bf16[32,96], index: 1, kind: input, shape index: {}]   ;;  %s408_s2 = inlined_call_operand.vmem [shape: f32[1,96], index: 2, kind: input, shape index: {}]   ;;  %s409_s3 = inlined_call_operand.vmem [shape: f32[2,32], index: 3, kind: output, shape index: {}]  }
   0x1 LB: > { %s294_s13 = sadd.s32 4294967295, %s346_s12   ;;  %p297_p0 = scmp.ge.s32.totalorder %s346_s12, 1  ;;  %s346_s12 = sphi %s374_s12, %s13_s12  }
   0x2   : > { %p131_p1 = scmp.lt.s32.totalorder %s346_s12, 9 }
   0x4   : > { %p132_p2 = pnand %p297_p0, %p131_p1 }
   0x5   : > { %p149_p3 = scmp.lt.s32.totalorder (!%p132_p2), %s294_s13, 7  ;;  %p299_p4 = scmp.ne.s32.totalorder (!%p132_p2), %s294_s13, 0 }
   0x6   : > { %135 = sbr.rel (%p132_p2) target bundleno = 710 (0x2c6), region = 32 }
   0xb   : > { %s150_s14 = scalar_select %p149_p3, %s294_s13, 7 }
   0xc   : > { %157 = sbr.rel (%p299_p4) target bundleno = 19 (0x13), region = 36 }
   0xd   : > { %s298_s15 = sshll.u32 %s150_s14, 1 }
   0xe   : > { %s152_s18 = scalar_lea.vmem %s406_s0, %s298_s15 }
  0x11   : > { %vm158_vm0 = vcmask 254976   ;;  %v348_v0 = vmov 0.0  }
  0x12   : > { %159 = vst.msk [vmem:[%s409_s3] sm:$0x3] %vm158_vm0, %v348_v0 }
  0x13 PF: > { %v332_v1 = vld [vmem:[%s407_s1 + $0x8] sm:$0xff]   ;;  %v349_v2 = vmov 0.0   ;;  %v333_v3 = vld [vmem:[%s407_s1] sm:$0xff]   ;;  %vm350_vm1 = vmmov 0   ;;  %vm186_vm2 = vcmask 261120   ;;  %s351_s29 = smov 64  }
  0x14   : > { %310 = vmatprep.subr.bf16.mxu0 %v349_v2  ;;  %314 = vmatprep.mubr.msk.bf16.mxu0 %vm350_vm1, %v349_v2  ;;  %v300_v6 = vld [vmem:[%s408_s2] ss:$0 sm:$0xff]  ;;  %s352_s30 = smov 96   ;;  %s353_s4 = smov 32   ;;  %vm264_vm3 = vcmask 254976  }
  0x15   : > { %311 = vmatpush3.bf16.msra.mxu0 %v332_v1  ;;  %v161_v12 = vld [vmem:[%s152_s18] sm:$0x3] }
  0x16   : > { %312 = vmatprep.subr.bf16.mxu0 %v349_v2 }
  0x19   : > { %v160_v4 = vld [vmem:[%s409_s3] sm:$0x3]  ;;  %313 = vmatpush3.bf16.msra.mxu0 %v333_v3 }
  0x1a   : > { %v162_v5 = vpack.c.bf16 %v160_v4, %v160_v4 }
  0x1c   : > { %315 = vmatmul.mubr.msk.bf16.vlgmr.msra.gmra.mxu0 %vm186_vm2, %v162_v5 }
  0xdc   : > { %v224_v7 = vpop.f32.mrf.mxu0 }
  0xdd   : > { %v225_v8 = vadd.f32 %v300_v6, %v224_v7 }
  0xde   : > { %v316_v9 = vpop.f32.mrf.mxu0 }
  0xdf   : > { %238 = vrot.lane.b32.xlu0 %v225_v8, %s351_s29  ;;  %v230_v13 = vadd.f32 %v225_v8, %v161_v12 }
  0xe0   : > { %v227_v10 = vpop.f32.mrf.mxu0 }
  0xe1   : > { %v304_v14 = vmul.f32 -1.442695, %v230_v13 }
  0xe2   : > { %v317_v11 = vpop.f32.mrf.mxu0 }
  0xe3   : > { %334 = vpow2.f32 %v304_v14 }
  0xf0   : > { %v335_v15 = vpop.eup %334 }
  0xf1   : > { %v234_v16 = vadd.f32 1.0, %v335_v15 }
  0xf3   : > { %336 = vrcp.f32 %v234_v16 }
 0x100   : > { %v337_v17 = vpop.eup %336 }
 0x101   : > { %v248_v24 = vsub.f32 1.0, %v337_v17 }
 0x151   : > { %v239_v18 = vpop.permute.xlu0 %238 }
 0x152   : > { %v241_v19 = vmul.f32 %v337_v17, %v239_v18 }
 0x154   : > { %243 = vrot.lane.b32.xlu0 %v241_v19, %s351_s29 }
 0x1c6   : > { %v244_v20 = vpop.permute.xlu0 %243 }
 0x1c7   : > { %v246_v21 = vadd.f32 %v244_v20, %v161_v12 }
 0x1c9   : > { %338 = vtanh.f32 %v246_v21 }
 0x1d6   : > { %v339_v22 = vpop.eup %338 }
 0x1d7   : > { %250 = vrot.lane.b32.xlu1 %v339_v22, %s352_s30 }
 0x1db   : > { %255 = vrot.lane.b32.xlu1 %v160_v4, %s353_s4 }
 0x249   : > { %v251_v23 = vpop.permute.xlu1 %250 }
 0x24a   : > { %v253_v26 = vmul.f32 %v251_v23, %v248_v24 }
 0x24d   : > { %v256_v25 = vpop.permute.xlu1 %255 }
 0x24e   : > { %v258_v27 = vmul.f32 %v337_v17, %v256_v25 }
 0x250   : > { %v259_v28 = vadd.f32 %v258_v27, %v253_v26 }
 0x252   : > { %261 = vrot.lane.b32.xlu0 %v259_v28, %s352_s30 }
 0x2c4   : > { %v262_v29 = vpop.permute.xlu0 %261 }
 0x2c5   : > { %265 = vst.msk [vmem:[%s409_s3] sm:$0x3] %vm264_vm3, %v262_v29 }
 0x2c6 PF: > { %s13_s12 = sadd.s32 1, %s346_s12  }
 0x2c7   : > { %p10_p5 = scmp.ge.s32.totalorder %s13_s12, 10  }
 0x2c9   :  { %12 = sbr.rel (!%p10_p5) target bundleno = 1 (0x1), region = 62 }

// kernel: iog_forward.5
= control target key start
LH: loop header
LB: loop body
LE: loop exit
PB: predicated region body
PF: predicated region fallthrough
CT: control target
= control target key end

     0   :  { %v357_v1 = vmov 0.0   ;;  %vm358_vm0 = vmmov 0   ;;  %vm186_vm1 = vcmask 1045504   ;;  %vm182_vm2 = vcmask 359424   ;;  %s463_s1 = inlined_call_operand.vmem [shape: bf16[300,96], index: 1, kind: input, shape index: {}]   ;;  %s464_s0 = inlined_call_operand.vmem [shape: f32[16,300], index: 0, kind: input, shape index: {}]   ;;  %s465_s2 = inlined_call_operand.vmem [shape: f32[1,96], index: 2, kind: input, shape index: {}]   ;;  %s466_s3 = inlined_call_operand.vmem [shape: f32[16,96], index: 3, kind: output, shape index: {}]  }
   0x1   :  { %v338_v0 = vld [vmem:[%s463_s1 + $0x78] sm:$0xff]   ;;  %326 = vmatprep.subr.bf16.mxu1 %v357_v1  ;;  %332 = vmatprep.mubr.msk.bf16.mxu1 %vm358_vm0, %v357_v1  ;;  %v340_v3 = vld [vmem:[%s463_s1 + $0x70] sm:$0xff]   ;;  %v342_v5 = vld [vmem:[%s463_s1 + $0x68] sm:$0xff]   ;;  %vm272_vm3 = vcmask 785408  }
   0x2   :  { %v339_v2 = vld [vmem:[%s463_s1 + $0x38] sm:$0xff]   ;;  %300 = vmatprep.subr.bf16.mxu0 %v338_v0  ;;  %v341_v4 = vld [vmem:[%s463_s1 + $0x30] sm:$0xff]   ;;  %v343_v6 = vld [vmem:[%s463_s1 + $0x28] sm:$0xff]  }
   0x3   :  { %301 = vmatpush3.bf16.msra.mxu0 %v339_v2  ;;  %v344_v7 = vld [vmem:[%s463_s1 + $0x60] sm:$0xff]   ;;  %v346_v9 = vld [vmem:[%s463_s1 + $0x58] sm:$0xff]   ;;  %v350_v10 = vld [vmem:[%s463_s1 + $0x90] sm:$0x3f]  }
   0x4   :  { %302 = vmatprep.subr.bf16.mxu0 %v340_v3  ;;  %v345_v8 = vld [vmem:[%s463_s1 + $0x20] sm:$0xff]   ;;  %v347_v11 = vld [vmem:[%s463_s1 + $0x18] sm:$0xff]   ;;  %v188_v12 = vsel %vm186_vm1, %v350_v10, 0  ;;  %v353_v13 = vld [vmem:[%s463_s1 + $0x88] sm:$0xff]  }
   0x5   :  { %327 = vmatpush3.bf16.msra.mxu1 %v188_v12  ;;  %v348_v14 = vld [vmem:[%s463_s1 + $0x50] sm:$0xff]   ;;  %v356_v16 = vld [vmem:[%s463_s1 + $0x80] sm:$0xff]   ;;  %v16_v17 = vld [vmem:[%s464_s0 + $0x8] sm:$0xff] }
   0x6   :  { %328 = vmatprep.subr.bf16.mxu1 %v357_v1  ;;  %v349_v15 = vld [vmem:[%s463_s1 + $0x10] sm:$0xff]   ;;  %v19_v18 = vld [vmem:[%s464_s0 + $0x20] sm:$0xff]  ;;  %v351_v19 = vld [vmem:[%s463_s1 + $0x48] sm:$0xff]  }
   0x7   :  { %303 = vmatpush3.bf16.msra.mxu0 %v341_v4  ;;  %v22_v20 = vpack.c.bf16 %v19_v18, %v16_v17  ;;  %v17_v21 = vld [vmem:[%s464_s0 + $0x10] sm:$0xff]  ;;  %v20_v22 = vld [vmem:[%s464_s0 + $0x28] sm:$0xff]  ;;  %v354_v25 = vld [vmem:[%s463_s1 + $0x40] sm:$0xff]  }
   0x8   :  { %304 = vmatprep.subr.bf16.mxu0 %v342_v5  ;;  %v23_v23 = vpack.c.bf16 %v20_v22, %v17_v21  ;;  %v352_v24 = vld [vmem:[%s463_s1 + $0x8] sm:$0xff]   ;;  %v355_v26 = vld [vmem:[%s463_s1] sm:$0xff]   ;;  %v18_v28 = vld [vmem:[%s464_s0 + $0x18] sm:$0xff] }
   0x9   :  { %329 = vmatpush3.bf16.msra.mxu1 %v353_v13  ;;  %222 = vmatprep.mubr.bf16.mxu0 %v22_v20  ;;  %v15_v27 = vld [vmem:[%s464_s0] sm:$0xff] }
   0xa   :  { %330 = vmatprep.subr.bf16.mxu1 %v357_v1  ;;  %v21_v29 = vpack.c.bf16 %v18_v28, %v15_v27  ;;  %v279_v35 = vld [vmem:[%s465_s2] ss:$0 sm:$0xff] }
   0xb   :  { %305 = vmatpush3.bf16.msra.mxu0 %v343_v6 }
   0xc   :  { %306 = vmatprep.subr.bf16.mxu0 %v344_v7 }
   0xd   :  { %331 = vmatpush3.bf16.msra.mxu1 %v356_v16 }
   0xf   :  { %307 = vmatpush3.bf16.msra.mxu0 %v345_v8 }
  0x10   :  { %308 = vmatprep.subr.bf16.mxu0 %v346_v9  ;;  %333 = vmatmul.mubr.msk.bf16.vlgmr.msra.gmra.mxu1 %vm182_vm2, %v23_v23 }
  0x13   :  { %309 = vmatpush3.bf16.msra.mxu0 %v347_v11 }
  0x14   :  { %310 = vmatprep.subr.bf16.mxu0 %v348_v14 }
  0x17   :  { %311 = vmatpush3.bf16.msra.mxu0 %v349_v15 }
  0x18   :  { %312 = vmatprep.subr.bf16.mxu0 %v351_v19 }
  0x1b   :  { %313 = vmatpush3.bf16.msra.mxu0 %v352_v24 }
  0x1c   :  { %314 = vmatprep.subr.bf16.mxu0 %v354_v25 }
  0x1f   :  { %315 = vmatpush3.bf16.msra.mxu0 %v355_v26 }
  0x22   :  { %223 = vmatmul.mubr.bf16.vlgmr.msra.gmra.mxu0 %v21_v29 }
  0xd0   :  { %v265_v30 = vpop.f32.mrf.mxu1 }
  0xd2   :  { %v334_v31 = vpop.f32.mrf.mxu1 }
  0xd4   :  { %v268_v32 = vpop.f32.mrf.mxu1 }
  0xd6   :  { %v335_v33 = vpop.f32.mrf.mxu1 }
  0xe2   :  { %v316_v34 = vpop.f32.mrf.mxu0 }
  0xe4   :  { %v317_v36 = vpop.f32.mrf.mxu0 }
  0xe5   :  { %v318_v37 = vadd.f32 %v317_v36, %v316_v34 }
  0xe6   :  { %v319_v38 = vpop.f32.mrf.mxu0 }
  0xe7   :  { %v225_v39 = vadd.f32 %v318_v37, %v279_v35 }
  0xe8   :  { %v320_v40 = vpop.f32.mrf.mxu0 }
  0xe9   :  { %v266_v41 = vadd.f32 %v265_v30, %v225_v39  ;;  %v321_v42 = vadd.f32 %v320_v40, %v319_v38 }
  0xeb   :  { %273 = vst.msk [vmem:[%s466_s3] sm:$0xff] %vm272_vm3, %v266_v41  ;;  %v228_v43 = vadd.f32 %v321_v42, %v279_v35 }
  0xed   :  { %v269_v44 = vadd.f32 %v268_v32, %v228_v43 }
  0xef   :  { %274 = vst.msk [vmem:[%s466_s3 + $0x8] sm:$0xff] %vm272_vm3, %v269_v44 }

// kernel: iog_forward.7
= control target key start
LH: loop header
LB: loop body
LE: loop exit
PB: predicated region body
PF: predicated region fallthrough
CT: control target
= control target key end

     0   :  { %vm48_vm0 = vcmask 1041408   ;;  %v365_v0 = vmov 0.0   ;;  %vm366_vm1 = vmmov 0   ;;  %vm44_vm2 = vcmask 31744   ;;  %s469_s1 = inlined_call_operand.vmem [shape: bf16[4,8], index: 1, kind: input, shape index: {}]   ;;  %s470_s0 = inlined_call_operand.vmem [shape: f32[16,4], index: 0, kind: input, shape index: {}]   ;;  %s471_s3 = inlined_call_operand.vmem [shape: bf16[8,16], index: 3, kind: input, shape index: {}]   ;;  %s472_s2 = inlined_call_operand.vmem [shape: f32[1,8], index: 2, kind: input, shape index: {}]   ;;  %s473_s5 = inlined_call_operand.vmem [shape: bf16[16,32], index: 5, kind: input, shape index: {}]   ;;  %s474_s4 = inlined_call_operand.vmem [shape: f32[1,16], index: 4, kind: input, shape index: {}]   ;;  %s475_s7 = inlined_call_operand.vmem [shape: bf16[32,64], index: 7, kind: input, shape index: {}]   ;;  %s476_s6 = inlined_call_operand.vmem [shape: f32[1,32], index: 6, kind: input, shape index: {}]   ;;  %s477_s8 = inlined_call_operand.vmem [shape: f32[1,64], index: 8, kind: input, shape index: {}]   ;;  %s478_s9 = inlined_call_operand.vmem [shape: f32[16,64], index: 9, kind: output, shape index: {}]  }
   0x1   :  { %334 = vmatprep.subr.bf16.mxu0 %v365_v0  ;;  %v36_v1 = vld [vmem:[%s469_s1] sm:$0x3]  ;;  %336 = vmatprep.mubr.msk.bf16.mxu0 %vm366_vm1, %v365_v0  ;;  %v34_v3 = vld [vmem:[%s470_s0 + $0x8] sm:$0xff]  ;;  %vm114_vm3 = vcmask 1043456   ;;  %vm110_vm6 = vcmask 64512   ;;  %vm183_vm9 = vcmask 130048  }
   0x2   :  { %v33_v2 = vld [vmem:[%s470_s0] sm:$0xff]  ;;  %v50_v4 = vsel %vm48_vm0, %v36_v1, 0  ;;  %340 = vmatprep.subr.bf16.mxu1 %v365_v0  ;;  %342 = vmatprep.mubr.msk.bf16.mxu1 %vm366_vm1, %v365_v0  ;;  %v363_v37 = vld [vmem:[%s475_s7 + $0x8] sm:$0xff]   ;;  %vm260_vm12 = vcmask 261120   ;;  %vm307_vm13 = vcmask 523264  }
   0x3   :  { %v35_v5 = vpack.c.bf16 %v34_v3, %v33_v2  ;;  %335 = vmatpush3.bf16.msra.mxu0 %v50_v4  ;;  %v102_v6 = vld [vmem:[%s471_s3] sm:$0xf] }
   0x4   :  { %346 = vmatprep.subr.bf16.mxu0 %v365_v0  ;;  %v116_v7 = vsel %vm114_vm3, %v102_v6, 0  ;;  %v314_v8 = vld [vmem:[%s472_s2] ss:$0 sm:$0xff] }
   0x5   :  { %341 = vmatpush3.bf16.msra.mxu1 %v116_v7  ;;  %v362_v22 = vld [vmem:[%s473_s5] sm:$0xff]  }
   0x6   :  { %337 = vmatmul.mubr.msk.bf16.vlgmr.msra.gmra.mxu0 %vm44_vm2, %v35_v5  ;;  %352 = vmatprep.subr.bf16.mxu1 %v365_v0  ;;  %v316_v23 = vld [vmem:[%s474_s4] ss:$0 sm:$0xff] }
   0x7   :  { %348 = vmatprep.mubr.msk.bf16.mxu0 %vm366_vm1, %v365_v0  ;;  %347 = vmatpush3.bf16.msra.mxu0 %v362_v22  ;;  %v364_v38 = vld [vmem:[%s475_s7] sm:$0xff]  }
   0x8   :  { %v318_v39 = vld [vmem:[%s476_s6] ss:$0 sm:$0xff] }
   0x9   :  { %v321_v53 = vld [vmem:[%s477_s8] ss:$0 sm:$0xff] }
  0xc6   :  { %v86_v9 = vpop.f32.mrf.mxu0 }
  0xc7   :  { %v87_v10 = vadd.f32 %v314_v8, %v86_v9 }
  0xc8   :  { %v338_v11 = vpop.f32.mrf.mxu0 }
  0xc9   :  { %v93_v12 = vmul.f32 0.74535596, %v87_v10 }
  0xca   :  { %v89_v13 = vpop.f32.mrf.mxu0 }
  0xcb   :  { %v90_v14 = vadd.f32 %v314_v8, %v89_v13  ;;  %v97_v16 = vmul.f32 0.2, %v93_v12  ;;  %vm95_vm4 = vcmp.ge.f32.partialorder %v93_v12, 0.0 }
  0xcc   :  { %v339_v15 = vpop.f32.mrf.mxu0 }
  0xcd   :  { %v94_v17 = vmul.f32 0.74535596, %v90_v14  ;;  %v99_v19 = vsel %vm95_vm4, %v93_v12, %v97_v16 }
  0xcf   :  { %vm96_vm5 = vcmp.ge.f32.partialorder %v94_v17, 0.0  ;;  %v98_v18 = vmul.f32 0.2, %v94_v17 }
  0xd1   :  { %v100_v20 = vsel %vm96_vm5, %v94_v17, %v98_v18 }
  0xd2   :  { %v101_v21 = vpack.c.bf16 %v100_v20, %v99_v19 }
  0xd4   :  { %343 = vmatmul.mubr.msk.bf16.vlgmr.msra.gmra.mxu1 %vm110_vm6, %v101_v21 }
  0xd5   :  { %356 = vmatprep.mubr.msk.bf16.mxu1 %vm366_vm1, %v365_v0  ;;  %353 = vmatpush3.bf16.msra.mxu1 %v363_v37 }
  0xd6   :  { %354 = vmatprep.subr.bf16.mxu1 %v365_v0 }
  0xd9   :  { %355 = vmatpush3.bf16.msra.mxu1 %v364_v38 }
 0x194   :  { %v152_v24 = vpop.f32.mrf.mxu1 }
 0x195   :  { %v153_v25 = vadd.f32 %v316_v23, %v152_v24 }
 0x196   :  { %v344_v26 = vpop.f32.mrf.mxu1 }
 0x197   :  { %v159_v27 = vmul.f32 0.74535596, %v153_v25 }
 0x198   :  { %v155_v28 = vpop.f32.mrf.mxu1 }
 0x199   :  { %v156_v29 = vadd.f32 %v316_v23, %v155_v28  ;;  %v163_v31 = vmul.f32 0.2, %v159_v27  ;;  %vm161_vm7 = vcmp.ge.f32.partialorder %v159_v27, 0.0 }
 0x19a   :  { %v345_v30 = vpop.f32.mrf.mxu1 }
 0x19b   :  { %v160_v32 = vmul.f32 0.74535596, %v156_v29  ;;  %v165_v34 = vsel %vm161_vm7, %v159_v27, %v163_v31 }
 0x19d   :  { %vm162_vm8 = vcmp.ge.f32.partialorder %v160_v32, 0.0  ;;  %v164_v33 = vmul.f32 0.2, %v160_v32 }
 0x19f   :  { %v166_v35 = vsel %vm162_vm8, %v160_v32, %v164_v33 }
 0x1a0   :  { %v167_v36 = vpack.c.bf16 %v166_v35, %v165_v34 }
 0x1a2   :  { %349 = vmatmul.mubr.msk.bf16.vlgmr.msra.gmra.mxu0 %vm183_vm9, %v167_v36 }
 0x262   :  { %v221_v40 = vpop.f32.mrf.mxu0 }
 0x263   :  { %v222_v41 = vadd.f32 %v318_v39, %v221_v40 }
 0x264   :  { %v350_v42 = vpop.f32.mrf.mxu0 }
 0x265   :  { %v228_v43 = vmul.f32 0.74535596, %v222_v41 }
 0x266   :  { %v224_v44 = vpop.f32.mrf.mxu0 }
 0x267   :  { %v225_v45 = vadd.f32 %v318_v39, %v224_v44  ;;  %v232_v47 = vmul.f32 0.2, %v228_v43  ;;  %vm230_vm10 = vcmp.ge.f32.partialorder %v228_v43, 0.0 }
 0x268   :  { %v351_v46 = vpop.f32.mrf.mxu0 }
 0x269   :  { %v229_v48 = vmul.f32 0.74535596, %v225_v45  ;;  %v234_v50 = vsel %vm230_vm10, %v228_v43, %v232_v47 }
 0x26b   :  { %vm231_vm11 = vcmp.ge.f32.partialorder %v229_v48, 0.0  ;;  %v233_v49 = vmul.f32 0.2, %v229_v48 }
 0x26d   :  { %v235_v51 = vsel %vm231_vm11, %v229_v48, %v233_v49 }
 0x26e   :  { %v236_v52 = vpack.c.bf16 %v235_v51, %v234_v50 }
 0x270   :  { %357 = vmatmul.mubr.msk.bf16.vlgmr.msra.gmra.mxu1 %vm260_vm12, %v236_v52 }
 0x330   :  { %v298_v54 = vpop.f32.mrf.mxu1 }
 0x331   :  { %v299_v55 = vadd.f32 %v321_v53, %v298_v54 }
 0x332   :  { %v358_v56 = vpop.f32.mrf.mxu1 }
 0x333   :  { %v305_v57 = vmax.f32 %v299_v55, 0.0 }
 0x334   :  { %v301_v58 = vpop.f32.mrf.mxu1 }
 0x335   :  { %308 = vst.msk [vmem:[%s478_s9] sm:$0xff] %vm307_vm13, %v305_v57  ;;  %v302_v59 = vadd.f32 %v321_v53, %v301_v58 }
 0x336   :  { %v359_v60 = vpop.f32.mrf.mxu1 }
 0x337   :  { %v306_v61 = vmax.f32 %v302_v59, 0.0 }
 0x339   :  { %309 = vst.msk [vmem:[%s478_s9 + $0x8] sm:$0xff] %vm307_vm13, %v306_v61 }

// kernel: iog_forward.9
= control target key start
LH: loop header
LB: loop body
LE: loop exit
PB: predicated region body
PF: predicated region fallthrough
CT: control target
= control target key end

     0   :  { %v473_v1 = vmov 0.0   ;;  %vm474_vm0 = vmmov 0   ;;  %vm64_vm1 = vcmask 261120   ;;  %s612_s0 = inlined_call_operand.vmem [shape: f32[2,32], index: 0, kind: input, shape index: {}]   ;;  %s613_s1 = inlined_call_operand.vmem [shape: f32[2,64], index: 1, kind: input, shape index: {}]   ;;  %s614_s2 = inlined_call_operand.vmem [shape: bf16[32,32], index: 2, kind: input, shape index: {}]   ;;  %s615_s3 = inlined_call_operand.vmem [shape: f32[1,32], index: 3, kind: input, shape index: {}]   ;;  %s616_s4 = inlined_call_operand.vmem [shape: bf16[64,32], index: 4, kind: input, shape index: {}]   ;;  %s617_s5 = inlined_call_operand.vmem [shape: f32[1,32], index: 5, kind: input, shape index: {}]   ;;  %s618_s6 = inlined_call_operand.vmem [shape: bf16[32,64], index: 6, kind: input, shape index: {}]   ;;  %s619_s7 = inlined_call_operand.vmem [shape: f32[1,64], index: 7, kind: input, shape index: {}]   ;;  %s620_s8 = inlined_call_operand.vmem [shape: bf16[64,128], index: 8, kind: input, shape index: {}]   ;;  %s621_s9 = inlined_call_operand.vmem [shape: f32[1,128], index: 9, kind: input, shape index: {}]   ;;  %s622_s10 = inlined_call_operand.hbm [shape: f32[2,128], index: 10, kind: output, shape index: {}]  }
   0x1   :  { %v439_v0 = vld [vmem:[%s614_s2 + $0x8] sm:$0xff]   ;;  %396 = vmatprep.subr.bf16.mxu1 %v473_v1  ;;  %416 = vmatprep.subr.bf16.mxu0 %v473_v1  ;;  %v440_v2 = vld [vmem:[%s614_s2] sm:$0xff]   ;;  %v441_v5 = vld [vmem:[%s616_s4 + $0x18] sm:$0xff]  }
   0x2   :  { %397 = vmatpush3.bf16.msra.mxu1 %v439_v0  ;;  %400 = vmatprep.mubr.msk.bf16.mxu1 %vm474_vm0, %v473_v1  ;;  %v37_v3 = vld [vmem:[%s612_s0] sm:$0x3]  ;;  %v442_v6 = vld [vmem:[%s616_s4 + $0x10] sm:$0xff]  }
   0x3   :  { %398 = vmatprep.subr.bf16.mxu1 %v473_v1  ;;  %420 = vmatprep.mubr.msk.bf16.mxu0 %vm474_vm0, %v473_v1  ;;  %v38_v4 = vpack.c.bf16 %v37_v3, %v37_v3 }
   0x6   :  { %399 = vmatpush3.bf16.msra.mxu1 %v440_v2 }
   0x7   :  { %404 = vmatprep.subr.bf16.mxu1 %v473_v1 }
   0x9   :  { %401 = vmatmul.mubr.msk.bf16.vlgmr.msra.gmra.mxu1 %vm64_vm1, %v38_v4 }
   0xa   :  { %405 = vmatpush3.bf16.msra.mxu1 %v441_v5  ;;  %412 = vmatprep.mubr.msk.bf16.mxu1 %vm474_vm0, %v473_v1 }
   0xb   :  { %406 = vmatprep.subr.bf16.mxu1 %v473_v1 }
   0xc   :  { %15 = vsyncpa [#allocation3], 0  ;;  %v443_v7 = vld [vmem:[%s616_s4 + $0x8] sm:$0xff]   ;;  %v444_v8 = vld [vmem:[%s616_s4] sm:$0xff]   ;;  %vm148_vm2 = vcmask 523264   ;;  %s475_s21 = smov [#allocation2]  }
   0xd   :  { %v39_v9 = vld [vmem:[%s613_s1] sm:$0x3]  ;;  %v445_v11 = vld [vmem:[%s618_s6 + $0x8] sm:$0xff]   ;;  %v447_v28 = vld [vmem:[%s620_s8 + $0x18] sm:$0xff]  }
   0xe   :  { %407 = vmatpush3.bf16.msra.mxu1 %v442_v6  ;;  %v40_v10 = vpack.c.bf16 %v39_v9, %v39_v9  ;;  %417 = vmatpush3.bf16.msra.mxu0 %v445_v11  ;;  %v446_v12 = vld [vmem:[%s618_s6] sm:$0xff]   ;;  %v448_v30 = vld [vmem:[%s620_s8 + $0x10] sm:$0xff]   ;;  %v449_v31 = vld [vmem:[%s620_s8 + $0x8] sm:$0xff]  }
   0xf   :  { %408 = vmatprep.subr.bf16.mxu1 %v473_v1  ;;  %418 = vmatprep.subr.bf16.mxu0 %v473_v1  ;;  %v360_v17 = vld [vmem:[%s615_s3] ss:$0 sm:$0xff] }
  0x10   :  { %v364_v18 = vld [vmem:[%s617_s5] ss:$0 sm:$0xff] }
  0x11   :  { %v450_v32 = vld [vmem:[%s620_s8] sm:$0xff]   ;;  %s352_s8 = sshll.u32 %s475_s21, 4  ;;  %s353_s8 = int_to_ptr.vmem [resolvable:$true] %s352_s8 }
  0x12   :  { %409 = vmatpush3.bf16.msra.mxu1 %v443_v7  ;;  %419 = vmatpush3.bf16.msra.mxu0 %v446_v12  ;;  %v370_v33 = vld [vmem:[%s619_s7] ss:$0 sm:$0xff]  ;;  %s451_s7 = scalar_lea.vmem %s353_s8, 32  ;;  %p456_p1 = scmp.lt.s32.totalorder %s353_s8, %s353_s8 }
  0x13   :  { %410 = vmatprep.subr.bf16.mxu1 %v473_v1  ;;  %424 = vmatprep.subr.bf16.mxu0 %v473_v1  ;;  %v374_v41 = vld [vmem:[%s621_s9] ss:$0 sm:$0xff]  ;;  %p452_p0 = scmp.ne.s32.totalorder %s353_s8, %s451_s7  ;;  %p457_p2 = scmp.lt.s32.totalorder %s451_s7, %s451_s7 }
  0x15   :  { %p458_p3 = por %p457_p2, %p456_p1 }
  0x16   :  { %411 = vmatpush3.bf16.msra.mxu1 %v444_v8 }
  0x17   :  { %p459_p4 = pnand %p458_p3, %p452_p0 }
  0x19   :  { %413 = vmatmul.mubr.msk.bf16.vlgmr.msra.gmra.mxu1 %vm148_vm2, %v40_v10 }
  0xc9   :  { %v102_v13 = vpop.f32.mrf.mxu1 }
  0xca   :  { %v103_v19 = vadd.f32 %v360_v17, %v102_v13 }
  0xcb   :  { %v402_v14 = vpop.f32.mrf.mxu1 }
  0xcc   :  { %v108_v23 = vmax.f32 %v103_v19, 0.0 }
  0xcd   :  { %v105_v15 = vpop.f32.mrf.mxu1 }
  0xcf   :  { %v403_v16 = vpop.f32.mrf.mxu1 }
  0xd9   :  { %v186_v20 = vpop.f32.mrf.mxu1 }
  0xda   :  { %v187_v21 = vadd.f32 %v364_v18, %v186_v20 }
  0xdb   :  { %v414_v22 = vpop.f32.mrf.mxu1 }
  0xdc   :  { %v192_v24 = vmax.f32 %v187_v21, 0.0 }
  0xdd   :  { %v189_v25 = vpop.f32.mrf.mxu1 }
  0xde   :  { %v193_v26 = vmul.f32 %v192_v24, %v108_v23 }
  0xdf   :  { %v415_v27 = vpop.f32.mrf.mxu1 }
  0xe0   :  { %v194_v29 = vpack.c.bf16 %v193_v26, %v193_v26 }
  0xe2   :  { %421 = vmatmul.mubr.msk.bf16.vlgmr.msra.gmra.mxu0 %vm64_vm1, %v194_v29 }
  0xe3   :  { %425 = vmatpush3.bf16.msra.mxu0 %v447_v28  ;;  %432 = vmatprep.mubr.msk.bf16.mxu0 %vm474_vm0, %v473_v1 }
  0xe4   :  { %426 = vmatprep.subr.bf16.mxu0 %v473_v1 }
  0xe7   :  { %427 = vmatpush3.bf16.msra.mxu0 %v448_v30 }
  0xe8   :  { %428 = vmatprep.subr.bf16.mxu0 %v473_v1 }
  0xeb   :  { %429 = vmatpush3.bf16.msra.mxu0 %v449_v31 }
  0xec   :  { %430 = vmatprep.subr.bf16.mxu0 %v473_v1 }
  0xef   :  { %431 = vmatpush3.bf16.msra.mxu0 %v450_v32 }
 0x1a2   :  { %v255_v34 = vpop.f32.mrf.mxu0 }
 0x1a3   :  { %v256_v35 = vadd.f32 %v370_v33, %v255_v34 }
 0x1a4   :  { %v422_v36 = vpop.f32.mrf.mxu0 }
 0x1a5   :  { %v261_v37 = vmax.f32 %v256_v35, 0.0 }
 0x1a6   :  { %v258_v38 = vpop.f32.mrf.mxu0 }
 0x1a7   :  { %v262_v39 = vpack.c.bf16 %v261_v37, %v261_v37 }
 0x1a8   :  { %v423_v40 = vpop.f32.mrf.mxu0 }
 0x1a9   :  { %433 = vmatmul.mubr.msk.bf16.vlgmr.msra.gmra.mxu0 %vm148_vm2, %v262_v39 }
 0x269   :  { %v339_v42 = vpop.f32.mrf.mxu0 }
 0x26a   :  { %v340_v43 = vadd.f32 %v374_v41, %v339_v42 }
 0x26b   :  { %v434_v44 = vpop.f32.mrf.mxu0 }
 0x26c   :  { %345 = vst [vmem:[#allocation2] sm:$0x3] %v340_v43 }
 0x26d   :  { %v342_v45 = vpop.f32.mrf.mxu0 }
 0x26e   :  { %462 = shalt.err (!%p459_p4)
}
 0x26f   :  { %355 = dma.vmem_to_hbm [thread:$0]  %s353_s8, 32, %s622_s10, [#allocation3]   ;;  %v435_v46 = vpop.f32.mrf.mxu0 }
 0x270   :  { %471 = dma.done.wait [#allocation3], 32  }
 0x271   :  { %472 = vsyncadd [#allocation3], 4294967264 }
 0x272   :  { %359 = vsyncpa [#allocation3], 1 }

// kernel: iog_forward.8
= control target key start
LH: loop header
LB: loop body
LE: loop exit
PB: predicated region body
PF: predicated region fallthrough
CT: control target
= control target key end

     0   :  { %v475_v0 = vmov 0.0   ;;  %vm476_vm0 = vmmov 0   ;;  %vm145_vm1 = vcmask 261120   ;;  %vm73_vm2 = vcmask 523264   ;;  %s590_s4 = inlined_call_operand.vmem [shape: bf16[32,32], index: 4, kind: input, shape index: {}]   ;;  %s591_s2 = inlined_call_operand.vmem [shape: bf16[64,32], index: 2, kind: input, shape index: {}]   ;;  %s592_s1 = inlined_call_operand.vmem [shape: f32[2,32], index: 1, kind: input, shape index: {}]   ;;  %s593_s0 = inlined_call_operand.vmem [shape: f32[2,8,64], index: 0, kind: input, shape index: {}]   ;;  %s594_s5 = inlined_call_operand.vmem [shape: f32[1,32], index: 5, kind: input, shape index: {}]   ;;  %s595_s6 = inlined_call_operand.vmem [shape: f32[1,32], index: 6, kind: input, shape index: {}]   ;;  %s596_s3 = inlined_call_operand.vmem [shape: f32[1,32], index: 3, kind: input, shape index: {}]   ;;  %s597_s7 = inlined_call_operand.<no memory space> [shape: f32[1,1], index: 7, kind: input, shape index: {}]   ;;  %s598_s8 = inlined_call_operand.vmem [shape: f32[2,64], index: 8, kind: output, shape index: {}]  }
   0x1   :  { %436 = vmatprep.subr.bf16.mxu1 %v475_v0  ;;  %v461_v1 = vld [vmem:[%s590_s4 + $0x8] sm:$0xff]   ;;  %424 = vmatprep.subr.bf16.mxu0 %v475_v0  ;;  %v462_v2 = vld [vmem:[%s590_s4] sm:$0xff]   ;;  %v463_v3 = vld [vmem:[%s591_s2 + $0x18] sm:$0xff]   ;;  %v477_v12 = vmov 1966171168   ;;  %v205_v14 = vlaneseq  ;;  %v478_v49 = vmov 0   ;;  %v219_v50 = vstv %s597_s7 }
   0x2   :  { %440 = vmatprep.mubr.msk.bf16.mxu1 %vm476_vm0, %v475_v0  ;;  %432 = vmatprep.mubr.msk.bf16.mxu0 %vm476_vm0, %v475_v0  ;;  %v120_v4 = vld [vmem:[%s592_s1] sm:$0x3]  ;;  %v464_v5 = vld [vmem:[%s591_s2 + $0x10] sm:$0xff]   ;;  %v465_v7 = vld [vmem:[%s591_s2 + $0x8] sm:$0xff]   ;;  %v203_v13 = vunpack.c.l.s4 %v477_v12  ;;  %vm322_vm3 = vcmask 7168   ;;  %vm389_vm4 = vcmask 1041409  }
   0x3   :  { %437 = vmatpush3.bf16.msra.mxu1 %v461_v1  ;;  %425 = vmatpush3.bf16.msra.mxu0 %v463_v3  ;;  %v121_v6 = vpack.c.bf16 %v120_v4, %v120_v4  ;;  %v466_v8 = vld [vmem:[%s591_s2] sm:$0xff]   ;;  %v557_v10 = vld [vmem:[%s593_s0 + $0x8] sm:$0xff]  ;;  %v206_v19 = vshrl.u32 %v205_v14, 7  ;;  %vm392_vm5 = vcmask 517120  }
   0x4   :  { %438 = vmatprep.subr.bf16.mxu1 %v475_v0  ;;  %426 = vmatprep.subr.bf16.mxu0 %v475_v0  ;;  %v552_v9 = vld [vmem:[%s593_s0] sm:$0xff]  ;;  %v204_v18 = vunpack.c.0.s8 %v203_v13 }
   0x5   :  { %v33_v11 = vpack.c.bf16 %v557_v10, %v552_v9  ;;  %v404_v15 = vld [vmem:[%s594_s5] ss:$0 sm:$0xff]  ;;  %v223_v32 = vsub.s32 0, %v206_v19  ;;  %460 = vset.pattern.permute.xlu0 %v478_v49 }
   0x6   :  { %v408_v20 = vld [vmem:[%s595_s6] ss:$0 sm:$0xff]  ;;  %v207_v25 = vsub.s32 %v204_v18, %v206_v19 }
   0x7   :  { %439 = vmatpush3.bf16.msra.mxu1 %v462_v2  ;;  %427 = vmatpush3.bf16.msra.mxu0 %v464_v5  ;;  %v398_v29 = vld [vmem:[%s596_s3] ss:$0 sm:$0xff] }
   0x8   :  { %444 = vmatprep.subr.bf16.mxu1 %v475_v0  ;;  %428 = vmatprep.subr.bf16.mxu0 %v475_v0 }
   0xa   :  { %441 = vmatmul.mubr.msk.bf16.vlgmr.msra.gmra.mxu1 %vm145_vm1, %v121_v6 }
   0xb   :  { %446 = vmatprep.mubr.msk.bf16.mxu1 %vm476_vm0, %v475_v0  ;;  %429 = vmatpush3.bf16.msra.mxu0 %v465_v7 }
   0xc   :  { %430 = vmatprep.subr.bf16.mxu0 %v475_v0 }
   0xf   :  { %431 = vmatpush3.bf16.msra.mxu0 %v466_v8 }
  0x10   :  { %450 = vmatprep.subr.bf16.mxu0 %v475_v0 }
  0x12   :  { %433 = vmatmul.mubr.msk.bf16.vlgmr.msra.gmra.mxu0 %vm73_vm2, %v33_v11 }
  0x13   :  { %452 = vmatprep.mubr.msk.bf16.mxu0 %vm476_vm0, %v475_v0 }
  0xca   :  { %v183_v16 = vpop.f32.mrf.mxu1 }
  0xcb   :  { %v184_v17 = vadd.f32 %v404_v15, %v183_v16 }
  0xcc   :  { %v442_v21 = vpop.f32.mrf.mxu1 }
  0xcd   :  { %v189_v22 = vmax.f32 %v184_v17, 0.0 }
  0xce   :  { %v186_v23 = vpop.f32.mrf.mxu1 }
  0xcf   :  { %v197_v24 = vmul.f32 %v408_v20, %v189_v22 }
  0xd0   :  { %v443_v26 = vpop.f32.mrf.mxu1 }
  0xd1   :  { %v198_v27 = vpack.c.bf16 %v197_v24, %v197_v24 }
  0xd2   :  { %v111_v30 = vpop.f32.mrf.mxu0 }
  0xd3   :  { %v208_v28 = vrot.slane %v198_v27, %v207_v25  ;;  %v112_v34 = vadd.f32 %v398_v29, %v111_v30 }
  0xd4   :  { %v434_v33 = vpop.f32.mrf.mxu0 }
  0xd5   :  { %v215_v31 = vrot.slane %v208_v28, %v207_v25  ;;  %v118_v41 = vmax.f32 %v112_v34, 0.0 }
  0xd6   :  { %v114_v37 = vpop.f32.mrf.mxu0 }
  0xd7   :  { %v409_v35 = vpack.i.b16 %v215_v31, %v215_v31  ;;  %v217_v36 = vunpack.i.h.s16 %v215_v31  ;;  %v115_v42 = vadd.f32 %v398_v29, %v114_v37  ;;  %v199_v46 = vpack.c.bf16 %v118_v41, %v118_v41 }
  0xd8   :  { %v435_v40 = vpop.f32.mrf.mxu0 }
  0xd9   :  { %v224_v38 = vrot.slane %v409_v35, %v223_v32  ;;  %v271_v39 = vpack.i.b16 %v217_v36, %v217_v36  ;;  %v119_v47 = vmax.f32 %v115_v42, 0.0 }
  0xdb   :  { %v229_v43 = vsel %vm145_vm1, %v224_v38, 0  ;;  %v275_v44 = vrot.slane %v271_v39, %v223_v32  ;;  %v200_v48 = vpack.c.bf16 %v119_v47, %v119_v47 }
  0xdc   :  { %445 = vmatpush3.bf16.xpose.msra.mxu1 %v229_v43 }
  0xdd   :  { %v280_v45 = vsel %vm145_vm1, %v275_v44, 0 }
  0xde   :  { %451 = vmatpush3.bf16.xpose.msra.mxu0 %v280_v45 }
  0xe3   :  { %447 = vmatmul.mubr.msk.bf16.vlgmr.msra.gmra.mxu1 %vm145_vm1, %v199_v46 }
  0xe5   :  { %453 = vmatmul.mubr.msk.bf16.vlgmr.msra.gmra.mxu0 %vm145_vm1, %v200_v48 }
 0x1a3   :  { %v265_v51 = vpop.f32.mrf.mxu1 }
 0x1a4   :  { %v266_v52 = vadd.f32 %v265_v51, %v219_v50 }
 0x1a5   :  { %v448_v53 = vpop.f32.mrf.mxu1  ;;  %v316_v54 = vpop.f32.mrf.mxu0 }
 0x1a6   :  { %v323_v55 = vsel %vm322_vm3, %v266_v52, -inf  ;;  %v317_v56 = vadd.f32 %v316_v54, %v219_v50 }
 0x1a7   :  { %v324_v57 = vrot.slane %v323_v55, 4  ;;  %v268_v58 = vpop.f32.mrf.mxu1  ;;  %v454_v59 = vpop.f32.mrf.mxu0 }
 0x1a8   :  { %v330_v60 = vsel %vm322_vm3, %v317_v56, -inf }
 0x1a9   :  { %v325_v61 = vmax.f32 %v323_v55, %v324_v57  ;;  %v331_v62 = vrot.slane %v330_v60, 4  ;;  %v449_v63 = vpop.f32.mrf.mxu1  ;;  %v319_v0 = vpop.f32.mrf.mxu0 }
 0x1ab   :  { %v326_v1 = vrot.slane %v325_v61, 2  ;;  %v332_v2 = vmax.f32 %v330_v60, %v331_v62  ;;  %v455_v3 = vpop.f32.mrf.mxu0 }
 0x1ad   :  { %v327_v4 = vmax.f32 %v325_v61, %v326_v1  ;;  %v333_v5 = vrot.slane %v332_v2, 2 }
 0x1af   :  { %v328_v6 = vrot.slane %v327_v4, 1  ;;  %v334_v7 = vmax.f32 %v332_v2, %v333_v5 }
 0x1b1   :  { %v329_v8 = vmax.f32 %v327_v4, %v328_v6  ;;  %v335_v11 = vrot.slane %v334_v7, 1 }
 0x1b3   :  { %v337_v12 = vsub.f32 %v266_v52, %v329_v8  ;;  %v336_v13 = vmax.f32 %v334_v7, %v335_v11 }
 0x1b5   :  { %v339_v14 = vmul.f32 1.442695, %v337_v12  ;;  %v338_v15 = vsub.f32 %v317_v56, %v336_v13 }
 0x1b7   :  { %467 = vpow2.f32 %v339_v14  ;;  %v341_v16 = vmul.f32 1.442695, %v338_v15 }
 0x1b9   :  { %469 = vpow2.f32 %v341_v16 }
 0x1c4   :  { %v468_v17 = vpop.eup %467 }
 0x1c5   :  { %v343_v18 = vsel %vm322_vm3, %v468_v17, 0.0 }
 0x1c6   :  { %v470_v19 = vpop.eup %469  ;;  %v344_v20 = vrot.slane %v343_v18, 4 }
 0x1c7   :  { %v350_v21 = vsel %vm322_vm3, %v470_v19, 0.0 }
 0x1c8   :  { %v345_v22 = vadd.f32 %v344_v20, %v343_v18  ;;  %v351_v23 = vrot.slane %v350_v21, 4 }
 0x1ca   :  { %v346_v24 = vrot.slane %v345_v22, 2  ;;  %v352_v25 = vadd.f32 %v351_v23, %v350_v21 }
 0x1cc   :  { %v347_v26 = vadd.f32 %v346_v24, %v345_v22  ;;  %v353_v27 = vrot.slane %v352_v25, 2 }
 0x1ce   :  { %v348_v28 = vrot.slane %v347_v26, 1  ;;  %v354_v29 = vadd.f32 %v353_v27, %v352_v25 }
 0x1d0   :  { %v349_v30 = vadd.f32 %v348_v28, %v347_v26  ;;  %v355_v31 = vrot.slane %v354_v29, 1 }
 0x1d2   :  { %471 = vrcp.f32 %v349_v30  ;;  %v356_v32 = vadd.f32 %v355_v31, %v354_v29 }
 0x1d4   :  { %473 = vrcp.f32 %v356_v32 }
 0x1df   :  { %v472_v33 = vpop.eup %471 }
 0x1e0   :  { %v359_v34 = vmul.f32 %v472_v33, %v468_v17 }
 0x1e1   :  { %v474_v35 = vpop.eup %473 }
 0x1e2   :  { %363 = vperm.xlu0 %460, %v359_v34   ;;  %v360_v36 = vmul.f32 %v474_v35, %v470_v19 }
 0x1e6   :  { %368 = vperm.xlu0 %460, %v360_v36  }
 0x25d   :  { %v364_v37 = vpop.permute.xlu0 %363 }
 0x25e   :  { %v371_v38 = vmul.f32 %v364_v37, %v552_v9 }
 0x260   :  { %v373_v39 = vsel %vm73_vm2, %v371_v38, 0.0 }
 0x261   :  { %v374_v40 = vrot.slane %v373_v39, 4  ;;  %v369_v41 = vpop.permute.xlu0 %368 }
 0x262   :  { %v372_v42 = vmul.f32 %v369_v41, %v557_v10 }
 0x263   :  { %v375_v43 = vadd.f32 %v374_v40, %v373_v39 }
 0x264   :  { %v380_v44 = vsel %vm73_vm2, %v372_v42, 0.0 }
 0x265   :  { %v376_v45 = vrot.slane %v375_v43, 2  ;;  %v381_v46 = vrot.slane %v380_v44, 4 }
 0x267   :  { %v377_v47 = vadd.f32 %v376_v45, %v375_v43  ;;  %v382_v48 = vadd.f32 %v381_v46, %v380_v44 }
 0x269   :  { %v383_v49 = vrot.slane %v382_v48, 2  ;;  %v378_v50 = vrot.slane %v377_v47, 1 }
 0x26b   :  { %v384_v51 = vadd.f32 %v383_v49, %v382_v48  ;;  %v379_v53 = vadd.f32 %v378_v50, %v377_v47 }
 0x26d   :  { %v385_v52 = vrot.slane %v384_v51, 1 }
 0x26f   :  { %v386_v9 = vadd.f32 %v385_v52, %v384_v51 }
 0x271   :  { %v390_v54 = vsel %vm389_vm4, %v386_v9, %v379_v53 }
 0x272   :  { %393 = vst.msk [vmem:[%s598_s8] sm:$0x3] %vm392_vm5, %v390_v54 }

</bundles_post_ra>
